<compile_context>
chip_gen: v5e
topology: v5e:2x2
jax: 0.10.0
libtpu: 0.0.40
codegen_flags: <defaults>
</compile_context>

<pallas_src>
import math

import jax
import jax.numpy as jnp
from jax.experimental import pallas as pl
from jax.experimental.pallas import tpu as pltpu

# ----------------------- small, forward-consistent config -----------------------
BATCH = 2
IN_CHANNELS = 3
IMAGE_SIZE = 16
PATCH = 8
DIM = 32
FF_DIM = 64
NUM_HEADS = 4
NUM_LAYERS = 2
NUM_CLASSES = 10
HEAD_DIM = DIM // NUM_HEADS
GRID_H = IMAGE_SIZE // PATCH
GRID_W = IMAGE_SIZE // PATCH
NUM_PATCHES = GRID_H * GRID_W
SEQ_LEN = NUM_PATCHES + 1            # +1 for the class token -> 5
S_PAD = 8                            # per-sample rows, padded to a sublane multiple (power of 2)
BS = BATCH * S_PAD                   # 16 : batch folded into the sublane axis
HBS = NUM_HEADS * BS                 # 64 : head-major attention rows
PATCH_DIM = IN_CHANNELS * PATCH * PATCH   # 192
LN_EPS = 1e-6
ATT_SCALE = 1.0 / math.sqrt(HEAD_DIM)

# ---- misc parameter slab row offsets (lane width DIM) ----
PW_OFF = 0                            # patch_w            rows   0:192
PB_OFF = PW_OFF + PATCH_DIM           # patch_b            row  192
CLS_OFF = PB_OFF + 1                  # class_token        row  193
NG_OFF = CLS_OFF + 1                  # final norm gamma   row  194
NB_OFF = NG_OFF + 1                   # final norm beta    row  195
FCB_OFF = NB_OFF + 1                  # fc bias (padded)   row  196
POS_OFF = 200                         # pos (pre-tiled)    rows 200:216  (8-row aligned)
FCW_OFF = POS_OFF + BS                # fc weight (padded) rows 216:248  (8-row aligned)
MISC_ROWS = FCW_OFF + DIM             # 248

# ---- per-layer vector slab row indices (lane width 3*DIM) ----
ROW_LN1G, ROW_LN1B, ROW_QKVB, ROW_BO, ROW_LN2G, ROW_LN2B, ROW_B1, ROW_B2 = range(8)


# ------------------------------ in-kernel helpers ---------------------------------
def _recip(x):
    # EUP approximate reciprocal + one Newton step (~full f32 accuracy, no VPU divide).
    r = pl.reciprocal(x, approx=True)
    return r * (2.0 - x * r)


def _erf(x):
    # TODO(synk): lax.erf lowering inside Mosaic is not guaranteed; exact-GELU's erf is
    # evaluated with an Abramowitz-Stegun 7.1.26 polynomial (|err| < 1.5e-7).
    a1, a2, a3, a4, a5 = 0.254829592, -0.284496736, 1.421413741, -1.453152027, 1.061405429
    p = 0.3275911
    sign = jnp.where(x >= 0.0, 1.0, -1.0)
    ax = jnp.abs(x)
    t = _recip(1.0 + p * ax)
    poly = ((((a5 * t + a4) * t + a3) * t + a2) * t + a1) * t
    return sign * (1.0 - poly * jnp.exp(-ax * ax))


def _gelu(x):
    # exact erf-GELU, matching torch.nn.functional.gelu default
    return 0.5 * x * (1.0 + _erf(x * (1.0 / math.sqrt(2.0))))


def _layernorm(x, g, b):
    mu = jnp.mean(x, axis=-1, keepdims=True)
    xc = x - mu
    var = jnp.mean(xc * xc, axis=-1, keepdims=True)   # biased, like torch LayerNorm
    return xc * jax.lax.rsqrt(var + LN_EPS) * g + b


# ---------------------------------- fused kernel ----------------------------------
def _vit_kernel(patches_ref, misc_ref, lmat_ref, lw2_ref, lvec_ref, out_ref):
    # ---- patch embedding + class token + positional embedding (batch-folded) ----
    patches = patches_ref[...]                                     # [BS, PATCH_DIM]
    pw = misc_ref[PW_OFF:PW_OFF + PATCH_DIM, :]                    # [PATCH_DIM, DIM]
    pb = misc_ref[PB_OFF:PB_OFF + 1, :]                            # [1, DIM]
    emb = jnp.dot(patches, pw, preferred_element_type=jnp.float32) + pb

    # per-sample row index 0..S_PAD-1 (S_PAD is a power of two -> bitwise and)
    s_idx = jnp.bitwise_and(
        jax.lax.broadcasted_iota(jnp.int32, (BS, 1), 0), S_PAD - 1)
    cls = misc_ref[CLS_OFF:CLS_OFF + 1, :]                         # [1, DIM]
    h = jnp.where(s_idx == 0, cls, emb)                            # row 0 of each sample = class token
    h = jnp.where(s_idx < SEQ_LEN, h, 0.0)                         # zero the sublane padding rows
    h = h + misc_ref[POS_OFF:POS_OFF + BS, :]                      # pos embedding, pre-tiled over batch

    # Block-diagonal attention mask over (head, batch) blocks of S_PAD rows,
    # with padded key columns (seq >= SEQ_LEN) masked out as well.
    ridx = jax.lax.broadcasted_iota(jnp.int32, (HBS, HBS), 0)
    cidx = jax.lax.broadcasted_iota(jnp.int32, (HBS, HBS), 1)
    same_blk = jnp.bitwise_and(jnp.bitwise_xor(ridx, cidx), -S_PAD) == 0
    key_ok = jnp.bitwise_and(cidx, S_PAD - 1) < SEQ_LEN
    att_mask = jnp.logical_and(same_blk, key_ok)

    for l in range(NUM_LAYERS):
        # ---- multi-head self attention (pre-norm), fused QKV, batched heads ----
        n1 = _layernorm(h,
                        lvec_ref[l, ROW_LN1G:ROW_LN1G + 1, 0:DIM],
                        lvec_ref[l, ROW_LN1B:ROW_LN1B + 1, 0:DIM])
        qkv = (jnp.dot(n1, lmat_ref[l, :, 0:3 * DIM],
                       preferred_element_type=jnp.float32)
               + lvec_ref[l, ROW_QKVB:ROW_QKVB + 1, 0:3 * DIM])    # [BS, 3*DIM]

        # head-major layout [NUM_HEADS*BS, HEAD_DIM]; heads are contiguous lane slices
        q_hm = jnp.concatenate(
            [qkv[:, hd * HEAD_DIM:(hd + 1) * HEAD_DIM] for hd in range(NUM_HEADS)], axis=0)
        k_hm = jnp.concatenate(
            [qkv[:, DIM + hd * HEAD_DIM:DIM + (hd + 1) * HEAD_DIM] for hd in range(NUM_HEADS)], axis=0)
        v_hm = jnp.concatenate(
            [qkv[:, 2 * DIM + hd * HEAD_DIM:2 * DIM + (hd + 1) * HEAD_DIM] for hd in range(NUM_HEADS)], axis=0)

        # one score matmul + one PV matmul for ALL heads and ALL batch samples
        s = jax.lax.dot_general(q_hm, k_hm, (((1,), (1,)), ((), ())),
                                preferred_element_type=jnp.float32) * ATT_SCALE   # [HBS, HBS]
        s = jnp.where(att_mask, s, -1e30)
        s = s - jnp.max(s, axis=-1, keepdims=True)
        p = jnp.exp(s)
        p = p * pl.reciprocal(jnp.sum(p, axis=-1, keepdims=True), approx=True)
        o_hm = jnp.dot(p, v_hm, preferred_element_type=jnp.float32)               # [HBS, HEAD_DIM]

        # back to model layout [BS, DIM] (heads -> lane blocks), single Wo matmul
        attn = jnp.concatenate(
            [o_hm[hd * BS:(hd + 1) * BS, :] for hd in range(NUM_HEADS)], axis=1)
        h = (h
             + jnp.dot(attn, lmat_ref[l, :, 3 * DIM:4 * DIM],
                       preferred_element_type=jnp.float32)
             + lvec_ref[l, ROW_BO:ROW_BO + 1, 0:DIM])                              # fused residual

        # ---- position-wise feed forward (pre-norm), fused GELU + residual ----
        n2 = _layernorm(h,
                        lvec_ref[l, ROW_LN2G:ROW_LN2G + 1, 0:DIM],
                        lvec_ref[l, ROW_LN2B:ROW_LN2B + 1, 0:DIM])
        f1 = _gelu(jnp.dot(n2, lmat_ref[l, :, 4 * DIM:4 * DIM + FF_DIM],
                           preferred_element_type=jnp.float32)
                   + lvec_ref[l, ROW_B1:ROW_B1 + 1, 0:FF_DIM])
        h = (h
             + jnp.dot(f1, lw2_ref[l], preferred_element_type=jnp.float32)
             + lvec_ref[l, ROW_B2:ROW_B2 + 1, 0:DIM])

    # ---- final LayerNorm + classification head on the class-token rows ----
    cls_rows = jnp.concatenate(
        [h[b * S_PAD:b * S_PAD + 1, :] for b in range(BATCH)], axis=0)             # [BATCH, DIM]
    cls_rows = _layernorm(cls_rows,
                          misc_ref[NG_OFF:NG_OFF + 1, :],
                          misc_ref[NB_OFF:NB_OFF + 1, :])
    logits = (jnp.dot(cls_rows, misc_ref[FCW_OFF:FCW_OFF + DIM, :],
                      preferred_element_type=jnp.float32)
              + misc_ref[FCB_OFF:FCB_OFF + 1, :])                                  # [BATCH, DIM]
    out_ref[...] = logits[:, :NUM_CLASSES]


# --------------------------------- host wrapper ------------------------------------
def _whole(shape):
    """Whole-array block (everything is tiny; one VMEM tile each)."""
    n = len(shape)
    return pl.BlockSpec(shape, lambda i, _n=n: (0,) * _n)


@jax.jit
def vit_forward(x, misc, lmat, lw2, lvec):
    B, C, H, W = x.shape
    gh, gw = H // PATCH, W // PATCH
    s0 = gh * gw
    pd = C * PATCH * PATCH

    # Conv2d(kernel=stride=patch) == per-patch linear on (c, fh, fw)-major patches.
    # (XLA fuses the reshape/transpose/pad below into one tiny copy fusion.)
    patches = (x.reshape(B, C, gh, PATCH, gw, PATCH)
                 .transpose(0, 2, 4, 1, 3, 5)
                 .reshape(B, s0, pd))
    # Row 0 of each sample is reserved for the class token; rows s0+1.. are sublane pad.
    patches_pad = jnp.pad(patches, ((0, 0), (1, S_PAD - 1 - s0), (0, 0))).reshape(B * S_PAD, pd)

    # NOTE: for larger batches on v7x one would keep a small "parallel" grid with
    # several folded samples per step to use both TensorCores; at BATCH=2 a single
    # folded step is the faster option on every generation.
    return pl.pallas_call(
        _vit_kernel,
        grid=(1,),
        in_specs=[
            _whole((B * S_PAD, pd)),                 # folded per-sample patch slab
            _whole((MISC_ROWS, DIM)),                # misc params slab
            _whole((NUM_LAYERS, DIM, 6 * DIM)),      # [qkv_w | wo | w1] per layer
            _whole((NUM_LAYERS, FF_DIM, DIM)),       # w2 per layer
            _whole((NUM_LAYERS, 8, 3 * DIM)),        # per-layer bias/scale vectors
        ],
        out_specs=_whole((B, NUM_CLASSES)),
        out_shape=jax.ShapeDtypeStruct((B, NUM_CLASSES), jnp.float32),
        compiler_params=pltpu.CompilerParams(dimension_semantics=("arbitrary",)),
    )(patches_pad, misc, lmat, lw2, lvec)


# ------------------------- one-time parameter packing -------------------------------
def pack_params(params):
    """Pack the ~21 small parameter arrays into 4 contiguous f32 slabs (done once)."""
    pos_pad = jnp.zeros((S_PAD, DIM), jnp.float32).at[:SEQ_LEN, :].set(params["pos_embedding"])
    pos_tiled = jnp.tile(pos_pad, (BATCH, 1))                                   # [BS, DIM]
    fcw_pad = jnp.zeros((DIM, DIM), jnp.float32).at[:, :NUM_CLASSES].set(params["fc_w"])
    fcb_pad = jnp.zeros((1, DIM), jnp.float32).at[:, :NUM_CLASSES].set(params["fc_b"])

    misc = jnp.concatenate([
        params["patch_w"],                        # rows   0:192
        params["patch_b"],                        # row  192
        params["class_token"],                    # row  193
        params["norm_g"],                         # row  194
        params["norm_b"],                         # row  195
        fcb_pad,                                  # row  196
        jnp.zeros((3, DIM), jnp.float32),         # rows 197:200  (alignment pad)
        pos_tiled,                                # rows 200:216
        fcw_pad,                                  # rows 216:248
    ], axis=0)
    assert misc.shape == (MISC_ROWS, DIM)

    lmat = jnp.concatenate([params["qkv_w"], params["wo"], params["w1"]], axis=2)  # [L, DIM, 6*DIM]
    lw2 = params["w2"]                                                             # [L, FF_DIM, DIM]

    def pad96(v):
        return jnp.pad(v, ((0, 0), (0, 0), (0, 3 * DIM - v.shape[-1])))

    lvec = jnp.concatenate([
        pad96(params["ln1_g"]), pad96(params["ln1_b"]),
        params["qkv_b"],
        pad96(params["bo"]),
        pad96(params["ln2_g"]), pad96(params["ln2_b"]),
        pad96(params["b1"]), pad96(params["b2"]),
    ], axis=1)                                                                     # [L, 8, 3*DIM]
    return misc, lmat, lw2, lvec


# ----------------------------- deterministic params -------------------------------
def init_params(key):
    keys = iter(jax.random.split(key, 32))

    def nrm(shape, std=0.02):
        return std * jax.random.normal(next(keys), shape, jnp.float32)

    L = NUM_LAYERS
    return dict(
        patch_w=nrm((PATCH_DIM, DIM)),
        patch_b=nrm((1, DIM), 1e-3),
        class_token=jnp.zeros((1, DIM), jnp.float32),           # torch init: zeros
        pos_embedding=nrm((SEQ_LEN, DIM)),                      # torch init: std 0.02
        norm_g=jnp.ones((1, DIM), jnp.float32),
        norm_b=jnp.zeros((1, DIM), jnp.float32),
        # NOTE: torch's init_weights zeroes fc; random here so the smoke test is nonzero.
        fc_w=nrm((DIM, NUM_CLASSES)),
        fc_b=nrm((1, NUM_CLASSES), 1e-3),
        ln1_g=jnp.ones((L, 1, DIM), jnp.float32),
        ln1_b=jnp.zeros((L, 1, DIM), jnp.float32),
        qkv_w=nrm((L, DIM, 3 * DIM)),                           # [Wq | Wk | Wv] fused
        qkv_b=nrm((L, 1, 3 * DIM), 1e-3),
        wo=nrm((L, DIM, DIM)),
        bo=nrm((L, 1, DIM), 1e-3),
        ln2_g=jnp.ones((L, 1, DIM), jnp.float32),
        ln2_b=jnp.zeros((L, 1, DIM), jnp.float32),
        w1=nrm((L, DIM, FF_DIM)),
        b1=nrm((L, 1, FF_DIM), 1e-3),
        w2=nrm((L, FF_DIM, DIM)),
        b2=nrm((L, 1, DIM), 1e-3),
    )


if __name__ == "__main__":
    key = jax.random.PRNGKey(0)
    pkey, xkey = jax.random.split(key)
    params = init_params(pkey)
    misc, lmat, lw2, lvec = pack_params(params)          # one-time packing, outside hot path
    x = jax.random.normal(xkey, (BATCH, IN_CHANNELS, IMAGE_SIZE, IMAGE_SIZE), jnp.float32)

    out = jax.block_until_ready(vit_forward(x, misc, lmat, lw2, lvec))
    assert out.shape == (BATCH, NUM_CLASSES), out.shape
    assert bool(jnp.all(jnp.isfinite(out)))
    print("KERNEL_OK")
</pallas_src>

<mosaic_0001>
module attributes {stable_mosaic.version = 11 : i64} {
  func.func @_vit_kernel(%arg0: i32, %arg1: memref<16x192xf32, #tpu.memory_space<vmem>>, %arg2: memref<248x32xf32, #tpu.memory_space<vmem>>, %arg3: memref<2x32x192xf32, #tpu.memory_space<vmem>>, %arg4: memref<2x64x32xf32, #tpu.memory_space<vmem>>, %arg5: memref<2x8x96xf32, #tpu.memory_space<vmem>>, %arg6: memref<2x10xf32, #tpu.memory_space<vmem>>) attributes {dimension_semantics = [#tpu.dimension_semantics<arbitrary>], iteration_bounds = array<i64: 1>, scalar_prefetch = 0 : i64, scratch_operands = 0 : i64, tpu.core_type = #tpu.core_type<tc>, window_params = [{pipeline_mode = #tpu.pipeline_mode<synchronous>, transform_indices = @transform_0, window_bounds = array<i64: 16, 192>}, {pipeline_mode = #tpu.pipeline_mode<synchronous>, transform_indices = @transform_1, window_bounds = array<i64: 248, 32>}, {pipeline_mode = #tpu.pipeline_mode<synchronous>, transform_indices = @transform_2, window_bounds = array<i64: 2, 32, 192>}, {pipeline_mode = #tpu.pipeline_mode<synchronous>, transform_indices = @transform_3, window_bounds = array<i64: 2, 64, 32>}, {pipeline_mode = #tpu.pipeline_mode<synchronous>, transform_indices = @transform_4, window_bounds = array<i64: 2, 8, 96>}, {pipeline_mode = #tpu.pipeline_mode<synchronous>, transform_indices = @transform_5, window_bounds = array<i64: 2, 10>}]} {
    %c0 = arith.constant 0 : index
    %c0_0 = arith.constant 0 : index
    %0 = vector.load %arg1[%c0, %c0_0] : memref<16x192xf32, #tpu.memory_space<vmem>>, vector<16x192xf32>
    %c0_1 = arith.constant 0 : index
    %c0_2 = arith.constant 0 : index
    %1 = vector.load %arg2[%c0_1, %c0_2] : memref<248x32xf32, #tpu.memory_space<vmem>>, vector<192x32xf32>
    %c192 = arith.constant 192 : index
    %c0_3 = arith.constant 0 : index
    %2 = vector.load %arg2[%c192, %c0_3] : memref<248x32xf32, #tpu.memory_space<vmem>>, vector<1x32xf32>
    %cst = arith.constant dense<0.000000e+00> : vector<16x32xf32>
    %3 = tpu.matmul %0, %1, %cst {dimension_numbers = #tpu.dot_dimension_numbers<[1], [0], [0], [1], [0, 0, 1, 1], [], []>} : vector<16x192xf32>, vector<192x32xf32>, vector<16x32xf32> -> vector<16x32xf32>
    %4 = vector.broadcast %2 : vector<1x32xf32> to vector<16x32xf32>
    %5 = arith.addf %3, %4 : vector<16x32xf32>
    %6 = tpu.iota {dimensions = array<i32: 0>} : vector<16x1xi32>
    %c7_i32 = arith.constant 7 : i32
    %7 = vector.broadcast %c7_i32 : i32 to vector<16x1xi32>
    %8 = arith.andi %6, %7 : vector<16x1xi32>
    %c193 = arith.constant 193 : index
    %c0_4 = arith.constant 0 : index
    %9 = vector.load %arg2[%c193, %c0_4] : memref<248x32xf32, #tpu.memory_space<vmem>>, vector<1x32xf32>
    %c0_i32 = arith.constant 0 : i32
    %10 = vector.broadcast %c0_i32 : i32 to vector<16x1xi32>
    %11 = arith.cmpi eq, %8, %10 : vector<16x1xi32>
    %12 = vector.shape_cast %11 : vector<16x1xi1> to vector<16x1xi1>
    %13 = vector.broadcast %12 : vector<16x1xi1> to vector<16x32xi1>
    %14 = vector.shape_cast %9 : vector<1x32xf32> to vector<1x32xf32>
    %15 = vector.broadcast %14 : vector<1x32xf32> to vector<16x32xf32>
    %16 = arith.select %13, %15, %5 : vector<16x32xi1>, vector<16x32xf32>
    %c5_i32 = arith.constant 5 : i32
    %17 = vector.broadcast %c5_i32 : i32 to vector<16x1xi32>
    %18 = arith.cmpi slt, %8, %17 : vector<16x1xi32>
    %cst_5 = arith.constant 0.000000e+00 : f32
    %19 = vector.shape_cast %18 : vector<16x1xi1> to vector<16x1xi1>
    %20 = vector.broadcast %19 : vector<16x1xi1> to vector<16x32xi1>
    %21 = vector.broadcast %cst_5 : f32 to vector<16x32xf32>
    %22 = arith.select %20, %16, %21 : vector<16x32xi1>, vector<16x32xf32>
    %c200 = arith.constant 200 : index
    %c0_6 = arith.constant 0 : index
    %23 = vector.load %arg2[%c200, %c0_6] : memref<248x32xf32, #tpu.memory_space<vmem>>, vector<16x32xf32>
    %24 = arith.addf %22, %23 : vector<16x32xf32>
    %25 = tpu.iota {dimensions = array<i32: 0>} : vector<64x64xi32>
    %26 = tpu.iota {dimensions = array<i32: 1>} : vector<64x64xi32>
    %27 = arith.xori %25, %26 : vector<64x64xi32>
    %c-8_i32 = arith.constant -8 : i32
    %28 = vector.broadcast %c-8_i32 : i32 to vector<64x64xi32>
    %29 = arith.andi %27, %28 : vector<64x64xi32>
    %c0_i32_7 = arith.constant 0 : i32
    %30 = vector.broadcast %c0_i32_7 : i32 to vector<64x64xi32>
    %31 = arith.cmpi eq, %29, %30 : vector<64x64xi32>
    %c7_i32_8 = arith.constant 7 : i32
    %32 = vector.broadcast %c7_i32_8 : i32 to vector<64x64xi32>
    %33 = arith.andi %26, %32 : vector<64x64xi32>
    %c5_i32_9 = arith.constant 5 : i32
    %34 = vector.broadcast %c5_i32_9 : i32 to vector<64x64xi32>
    %35 = arith.cmpi slt, %33, %34 : vector<64x64xi32>
    %36 = arith.andi %31, %35 : vector<64x64xi1>
    %c0_10 = arith.constant 0 : index
    %c0_11 = arith.constant 0 : index
    %c0_12 = arith.constant 0 : index
    %37 = vector.load %arg5[%c0_10, %c0_11, %c0_12] : memref<2x8x96xf32, #tpu.memory_space<vmem>>, vector<1x1x32xf32>
    %38 = vector.shape_cast %37 : vector<1x1x32xf32> to vector<1x32xf32>
    %c0_13 = arith.constant 0 : index
    %c1 = arith.constant 1 : index
    %c0_14 = arith.constant 0 : index
    %39 = vector.load %arg5[%c0_13, %c1, %c0_14] : memref<2x8x96xf32, #tpu.memory_space<vmem>>, vector<1x1x32xf32>
    %40 = vector.shape_cast %39 : vector<1x1x32xf32> to vector<1x32xf32>
    %cst_15 = arith.constant dense<0.000000e+00> : vector<16xf32>
    %41 = vector.multi_reduction <add>, %24, %cst_15 [1] : vector<16x32xf32> to vector<16xf32>
    %42 = vector.shape_cast %41 : vector<16xf32> to vector<16x1xf32>
    %cst_16 = arith.constant 3.200000e+01 : f32
    %43 = vector.broadcast %cst_16 : f32 to vector<16x1xf32>
    %44 = arith.divf %42, %43 : vector<16x1xf32>
    %45 = vector.broadcast %44 : vector<16x1xf32> to vector<16x32xf32>
    %46 = arith.subf %24, %45 : vector<16x32xf32>
    %47 = arith.mulf %46, %46 : vector<16x32xf32>
    %cst_17 = arith.constant dense<0.000000e+00> : vector<16xf32>
    %48 = vector.multi_reduction <add>, %47, %cst_17 [1] : vector<16x32xf32> to vector<16xf32>
    %49 = vector.shape_cast %48 : vector<16xf32> to vector<16x1xf32>
    %cst_18 = arith.constant 3.200000e+01 : f32
    %50 = vector.broadcast %cst_18 : f32 to vector<16x1xf32>
    %51 = arith.divf %49, %50 : vector<16x1xf32>
    %cst_19 = arith.constant 9.99999997E-7 : f32
    %52 = vector.broadcast %cst_19 : f32 to vector<16x1xf32>
    %53 = arith.addf %51, %52 : vector<16x1xf32>
    %54 = math.rsqrt %53 : vector<16x1xf32>
    %55 = vector.broadcast %54 : vector<16x1xf32> to vector<16x32xf32>
    %56 = arith.mulf %46, %55 : vector<16x32xf32>
    %57 = vector.broadcast %38 : vector<1x32xf32> to vector<16x32xf32>
    %58 = arith.mulf %56, %57 : vector<16x32xf32>
    %59 = vector.broadcast %40 : vector<1x32xf32> to vector<16x32xf32>
    %60 = arith.addf %58, %59 : vector<16x32xf32>
    %c0_20 = arith.constant 0 : index
    %c0_21 = arith.constant 0 : index
    %c0_22 = arith.constant 0 : index
    %61 = vector.load %arg3[%c0_20, %c0_21, %c0_22] : memref<2x32x192xf32, #tpu.memory_space<vmem>>, vector<1x32x96xf32>
    %62 = vector.shape_cast %61 : vector<1x32x96xf32> to vector<32x96xf32>
    %cst_23 = arith.constant dense<0.000000e+00> : vector<16x96xf32>
    %63 = tpu.matmul %60, %62, %cst_23 {dimension_numbers = #tpu.dot_dimension_numbers<[1], [0], [0], [1], [0, 0, 1, 1], [], []>} : vector<16x32xf32>, vector<32x96xf32>, vector<16x96xf32> -> vector<16x96xf32>
    %c0_24 = arith.constant 0 : index
    %c2 = arith.constant 2 : index
    %c0_25 = arith.constant 0 : index
    %64 = vector.load %arg5[%c0_24, %c2, %c0_25] : memref<2x8x96xf32, #tpu.memory_space<vmem>>, vector<1x1x96xf32>
    %65 = vector.shape_cast %64 : vector<1x1x96xf32> to vector<1x96xf32>
    %66 = vector.broadcast %65 : vector<1x96xf32> to vector<16x96xf32>
    %67 = arith.addf %63, %66 : vector<16x96xf32>
    %68 = vector.extract_strided_slice %67 {offsets = [0, 0], sizes = [16, 8], strides = [1, 1]} : vector<16x96xf32> to vector<16x8xf32>
    %69 = vector.extract_strided_slice %67 {offsets = [0, 8], sizes = [16, 8], strides = [1, 1]} : vector<16x96xf32> to vector<16x8xf32>
    %70 = vector.extract_strided_slice %67 {offsets = [0, 16], sizes = [16, 8], strides = [1, 1]} : vector<16x96xf32> to vector<16x8xf32>
    %71 = vector.extract_strided_slice %67 {offsets = [0, 24], sizes = [16, 8], strides = [1, 1]} : vector<16x96xf32> to vector<16x8xf32>
    %72 = tpu.concatenate %68, %69, %70, %71 in 0 : vector<16x8xf32>, vector<16x8xf32>, vector<16x8xf32>, vector<16x8xf32> -> vector<64x8xf32>
    %73 = vector.extract_strided_slice %67 {offsets = [0, 32], sizes = [16, 8], strides = [1, 1]} : vector<16x96xf32> to vector<16x8xf32>
    %74 = vector.extract_strided_slice %67 {offsets = [0, 40], sizes = [16, 8], strides = [1, 1]} : vector<16x96xf32> to vector<16x8xf32>
    %75 = vector.extract_strided_slice %67 {offsets = [0, 48], sizes = [16, 8], strides = [1, 1]} : vector<16x96xf32> to vector<16x8xf32>
    %76 = vector.extract_strided_slice %67 {offsets = [0, 56], sizes = [16, 8], strides = [1, 1]} : vector<16x96xf32> to vector<16x8xf32>
    %77 = tpu.concatenate %73, %74, %75, %76 in 0 : vector<16x8xf32>, vector<16x8xf32>, vector<16x8xf32>, vector<16x8xf32> -> vector<64x8xf32>
    %78 = vector.extract_strided_slice %67 {offsets = [0, 64], sizes = [16, 8], strides = [1, 1]} : vector<16x96xf32> to vector<16x8xf32>
    %79 = vector.extract_strided_slice %67 {offsets = [0, 72], sizes = [16, 8], strides = [1, 1]} : vector<16x96xf32> to vector<16x8xf32>
    %80 = vector.extract_strided_slice %67 {offsets = [0, 80], sizes = [16, 8], strides = [1, 1]} : vector<16x96xf32> to vector<16x8xf32>
    %81 = vector.extract_strided_slice %67 {offsets = [0, 88], sizes = [16, 8], strides = [1, 1]} : vector<16x96xf32> to vector<16x8xf32>
    %82 = tpu.concatenate %78, %79, %80, %81 in 0 : vector<16x8xf32>, vector<16x8xf32>, vector<16x8xf32>, vector<16x8xf32> -> vector<64x8xf32>
    %cst_26 = arith.constant dense<0.000000e+00> : vector<64x64xf32>
    %83 = tpu.matmul %72, %77, %cst_26 {dimension_numbers = #tpu.dot_dimension_numbers<[1], [1], [0], [0], [0, 0, 1, 0], [], []>} : vector<64x8xf32>, vector<64x8xf32>, vector<64x64xf32> -> vector<64x64xf32>
    %cst_27 = arith.constant 0.353553385 : f32
    %84 = vector.broadcast %cst_27 : f32 to vector<64x64xf32>
    %85 = arith.mulf %83, %84 : vector<64x64xf32>
    %cst_28 = arith.constant -1.000000e+30 : f32
    %86 = vector.broadcast %cst_28 : f32 to vector<64x64xf32>
    %87 = arith.select %36, %85, %86 : vector<64x64xi1>, vector<64x64xf32>
    %cst_29 = arith.constant dense<0xFF800000> : vector<64xf32>
    %88 = vector.multi_reduction <maximumf>, %87, %cst_29 [1] : vector<64x64xf32> to vector<64xf32>
    %89 = vector.shape_cast %88 : vector<64xf32> to vector<64x1xf32>
    %90 = vector.broadcast %89 : vector<64x1xf32> to vector<64x64xf32>
    %91 = arith.subf %87, %90 : vector<64x64xf32>
    %92 = math.exp %91 : vector<64x64xf32>
    %cst_30 = arith.constant dense<0.000000e+00> : vector<64xf32>
    %93 = vector.multi_reduction <add>, %92, %cst_30 [1] : vector<64x64xf32> to vector<64xf32>
    %94 = vector.shape_cast %93 : vector<64xf32> to vector<64x1xf32>
    %95 = tpu.reciprocal %94 {approx = true} : vector<64x1xf32> -> vector<64x1xf32>
    %96 = vector.broadcast %95 : vector<64x1xf32> to vector<64x64xf32>
    %97 = arith.mulf %92, %96 : vector<64x64xf32>
    %cst_31 = arith.constant dense<0.000000e+00> : vector<64x8xf32>
    %98 = tpu.matmul %97, %82, %cst_31 {dimension_numbers = #tpu.dot_dimension_numbers<[1], [0], [0], [1], [0, 0, 1, 1], [], []>} : vector<64x64xf32>, vector<64x8xf32>, vector<64x8xf32> -> vector<64x8xf32>
    %99 = vector.extract_strided_slice %98 {offsets = [0, 0], sizes = [16, 8], strides = [1, 1]} : vector<64x8xf32> to vector<16x8xf32>
    %100 = vector.extract_strided_slice %98 {offsets = [16, 0], sizes = [16, 8], strides = [1, 1]} : vector<64x8xf32> to vector<16x8xf32>
    %101 = vector.extract_strided_slice %98 {offsets = [32, 0], sizes = [16, 8], strides = [1, 1]} : vector<64x8xf32> to vector<16x8xf32>
    %102 = vector.extract_strided_slice %98 {offsets = [48, 0], sizes = [16, 8], strides = [1, 1]} : vector<64x8xf32> to vector<16x8xf32>
    %103 = tpu.concatenate %99, %100, %101, %102 in 1 : vector<16x8xf32>, vector<16x8xf32>, vector<16x8xf32>, vector<16x8xf32> -> vector<16x32xf32>
    %c0_32 = arith.constant 0 : index
    %c0_33 = arith.constant 0 : index
    %c96 = arith.constant 96 : index
    %104 = vector.load %arg3[%c0_32, %c0_33, %c96] : memref<2x32x192xf32, #tpu.memory_space<vmem>>, vector<1x32x32xf32>
    %105 = vector.shape_cast %104 : vector<1x32x32xf32> to vector<32x32xf32>
    %cst_34 = arith.constant dense<0.000000e+00> : vector<16x32xf32>
    %106 = tpu.matmul %103, %105, %cst_34 {dimension_numbers = #tpu.dot_dimension_numbers<[1], [0], [0], [1], [0, 0, 1, 1], [], []>} : vector<16x32xf32>, vector<32x32xf32>, vector<16x32xf32> -> vector<16x32xf32>
    %107 = arith.addf %24, %106 : vector<16x32xf32>
    %c0_35 = arith.constant 0 : index
    %c3 = arith.constant 3 : index
    %c0_36 = arith.constant 0 : index
    %108 = vector.load %arg5[%c0_35, %c3, %c0_36] : memref<2x8x96xf32, #tpu.memory_space<vmem>>, vector<1x1x32xf32>
    %109 = vector.shape_cast %108 : vector<1x1x32xf32> to vector<1x32xf32>
    %110 = vector.broadcast %109 : vector<1x32xf32> to vector<16x32xf32>
    %111 = arith.addf %107, %110 : vector<16x32xf32>
    %c0_37 = arith.constant 0 : index
    %c4 = arith.constant 4 : index
    %c0_38 = arith.constant 0 : index
    %112 = vector.load %arg5[%c0_37, %c4, %c0_38] : memref<2x8x96xf32, #tpu.memory_space<vmem>>, vector<1x1x32xf32>
    %113 = vector.shape_cast %112 : vector<1x1x32xf32> to vector<1x32xf32>
    %c0_39 = arith.constant 0 : index
    %c5 = arith.constant 5 : index
    %c0_40 = arith.constant 0 : index
    %114 = vector.load %arg5[%c0_39, %c5, %c0_40] : memref<2x8x96xf32, #tpu.memory_space<vmem>>, vector<1x1x32xf32>
    %115 = vector.shape_cast %114 : vector<1x1x32xf32> to vector<1x32xf32>
    %cst_41 = arith.constant dense<0.000000e+00> : vector<16xf32>
    %116 = vector.multi_reduction <add>, %111, %cst_41 [1] : vector<16x32xf32> to vector<16xf32>
    %117 = vector.shape_cast %116 : vector<16xf32> to vector<16x1xf32>
    %cst_42 = arith.constant 3.200000e+01 : f32
    %118 = vector.broadcast %cst_42 : f32 to vector<16x1xf32>
    %119 = arith.divf %117, %118 : vector<16x1xf32>
    %120 = vector.broadcast %119 : vector<16x1xf32> to vector<16x32xf32>
    %121 = arith.subf %111, %120 : vector<16x32xf32>
    %122 = arith.mulf %121, %121 : vector<16x32xf32>
    %cst_43 = arith.constant dense<0.000000e+00> : vector<16xf32>
    %123 = vector.multi_reduction <add>, %122, %cst_43 [1] : vector<16x32xf32> to vector<16xf32>
    %124 = vector.shape_cast %123 : vector<16xf32> to vector<16x1xf32>
    %cst_44 = arith.constant 3.200000e+01 : f32
    %125 = vector.broadcast %cst_44 : f32 to vector<16x1xf32>
    %126 = arith.divf %124, %125 : vector<16x1xf32>
    %cst_45 = arith.constant 9.99999997E-7 : f32
    %127 = vector.broadcast %cst_45 : f32 to vector<16x1xf32>
    %128 = arith.addf %126, %127 : vector<16x1xf32>
    %129 = math.rsqrt %128 : vector<16x1xf32>
    %130 = vector.broadcast %129 : vector<16x1xf32> to vector<16x32xf32>
    %131 = arith.mulf %121, %130 : vector<16x32xf32>
    %132 = vector.broadcast %113 : vector<1x32xf32> to vector<16x32xf32>
    %133 = arith.mulf %131, %132 : vector<16x32xf32>
    %134 = vector.broadcast %115 : vector<1x32xf32> to vector<16x32xf32>
    %135 = arith.addf %133, %134 : vector<16x32xf32>
    %c0_46 = arith.constant 0 : index
    %c0_47 = arith.constant 0 : index
    %c128 = arith.constant 128 : index
    %136 = vector.load %arg3[%c0_46, %c0_47, %c128] : memref<2x32x192xf32, #tpu.memory_space<vmem>>, vector<1x32x64xf32>
    %137 = vector.shape_cast %136 : vector<1x32x64xf32> to vector<32x64xf32>
    %cst_48 = arith.constant dense<0.000000e+00> : vector<16x64xf32>
    %138 = tpu.matmul %135, %137, %cst_48 {dimension_numbers = #tpu.dot_dimension_numbers<[1], [0], [0], [1], [0, 0, 1, 1], [], []>} : vector<16x32xf32>, vector<32x64xf32>, vector<16x64xf32> -> vector<16x64xf32>
    %c0_49 = arith.constant 0 : index
    %c6 = arith.constant 6 : index
    %c0_50 = arith.constant 0 : index
    %139 = vector.load %arg5[%c0_49, %c6, %c0_50] : memref<2x8x96xf32, #tpu.memory_space<vmem>>, vector<1x1x64xf32>
    %140 = vector.shape_cast %139 : vector<1x1x64xf32> to vector<1x64xf32>
    %141 = vector.broadcast %140 : vector<1x64xf32> to vector<16x64xf32>
    %142 = arith.addf %138, %141 : vector<16x64xf32>
    %cst_51 = arith.constant 5.000000e-01 : f32
    %143 = vector.broadcast %cst_51 : f32 to vector<16x64xf32>
    %144 = arith.mulf %143, %142 : vector<16x64xf32>
    %cst_52 = arith.constant 0.707106769 : f32
    %145 = vector.broadcast %cst_52 : f32 to vector<16x64xf32>
    %146 = arith.mulf %142, %145 : vector<16x64xf32>
    %cst_53 = arith.constant 0.000000e+00 : f32
    %147 = vector.broadcast %cst_53 : f32 to vector<16x64xf32>
    %148 = arith.cmpf oge, %146, %147 : vector<16x64xf32>
    %cst_54 = arith.constant 1.000000e+00 : f32
    %cst_55 = arith.constant -1.000000e+00 : f32
    %149 = vector.broadcast %cst_54 : f32 to vector<16x64xf32>
    %150 = vector.broadcast %cst_55 : f32 to vector<16x64xf32>
    %151 = arith.select %148, %149, %150 : vector<16x64xi1>, vector<16x64xf32>
    %152 = math.absf %146 : vector<16x64xf32>
    %cst_56 = arith.constant 0.327591091 : f32
    %153 = vector.broadcast %cst_56 : f32 to vector<16x64xf32>
    %154 = arith.mulf %153, %152 : vector<16x64xf32>
    %cst_57 = arith.constant 1.000000e+00 : f32
    %155 = vector.broadcast %cst_57 : f32 to vector<16x64xf32>
    %156 = arith.addf %155, %154 : vector<16x64xf32>
    %157 = tpu.reciprocal %156 {approx = true} : vector<16x64xf32> -> vector<16x64xf32>
    %158 = arith.mulf %156, %157 : vector<16x64xf32>
    %cst_58 = arith.constant 2.000000e+00 : f32
    %159 = vector.broadcast %cst_58 : f32 to vector<16x64xf32>
    %160 = arith.subf %159, %158 : vector<16x64xf32>
    %161 = arith.mulf %157, %160 : vector<16x64xf32>
    %cst_59 = arith.constant 1.06140542 : f32
    %162 = vector.broadcast %cst_59 : f32 to vector<16x64xf32>
    %163 = arith.mulf %162, %161 : vector<16x64xf32>
    %cst_60 = arith.constant -1.45315206 : f32
    %164 = vector.broadcast %cst_60 : f32 to vector<16x64xf32>
    %165 = arith.addf %163, %164 : vector<16x64xf32>
    %166 = arith.mulf %165, %161 : vector<16x64xf32>
    %cst_61 = arith.constant 1.42141378 : f32
    %167 = vector.broadcast %cst_61 : f32 to vector<16x64xf32>
    %168 = arith.addf %166, %167 : vector<16x64xf32>
    %169 = arith.mulf %168, %161 : vector<16x64xf32>
    %cst_62 = arith.constant -0.284496725 : f32
    %170 = vector.broadcast %cst_62 : f32 to vector<16x64xf32>
    %171 = arith.addf %169, %170 : vector<16x64xf32>
    %172 = arith.mulf %171, %161 : vector<16x64xf32>
    %cst_63 = arith.constant 0.254829586 : f32
    %173 = vector.broadcast %cst_63 : f32 to vector<16x64xf32>
    %174 = arith.addf %172, %173 : vector<16x64xf32>
    %175 = arith.mulf %174, %161 : vector<16x64xf32>
    %cst_64 = arith.constant 0.000000e+00 : f32
    %176 = vector.broadcast %cst_64 : f32 to vector<16x64xf32>
    %177 = arith.subf %176, %152 : vector<16x64xf32>
    %178 = arith.mulf %177, %152 : vector<16x64xf32>
    %179 = math.exp %178 : vector<16x64xf32>
    %180 = arith.mulf %175, %179 : vector<16x64xf32>
    %cst_65 = arith.constant 1.000000e+00 : f32
    %181 = vector.broadcast %cst_65 : f32 to vector<16x64xf32>
    %182 = arith.subf %181, %180 : vector<16x64xf32>
    %183 = arith.mulf %151, %182 : vector<16x64xf32>
    %cst_66 = arith.constant 1.000000e+00 : f32
    %184 = vector.broadcast %cst_66 : f32 to vector<16x64xf32>
    %185 = arith.addf %184, %183 : vector<16x64xf32>
    %186 = arith.mulf %144, %185 : vector<16x64xf32>
    %c0_67 = arith.constant 0 : index
    %c0_68 = arith.constant 0 : index
    %c0_69 = arith.constant 0 : index
    %187 = vector.load %arg4[%c0_67, %c0_68, %c0_69] : memref<2x64x32xf32, #tpu.memory_space<vmem>>, vector<1x64x32xf32>
    %188 = vector.shape_cast %187 : vector<1x64x32xf32> to vector<64x32xf32>
    %cst_70 = arith.constant dense<0.000000e+00> : vector<16x32xf32>
    %189 = tpu.matmul %186, %188, %cst_70 {dimension_numbers = #tpu.dot_dimension_numbers<[1], [0], [0], [1], [0, 0, 1, 1], [], []>} : vector<16x64xf32>, vector<64x32xf32>, vector<16x32xf32> -> vector<16x32xf32>
    %190 = arith.addf %111, %189 : vector<16x32xf32>
    %c0_71 = arith.constant 0 : index
    %c7 = arith.constant 7 : index
    %c0_72 = arith.constant 0 : index
    %191 = vector.load %arg5[%c0_71, %c7, %c0_72] : memref<2x8x96xf32, #tpu.memory_space<vmem>>, vector<1x1x32xf32>
    %192 = vector.shape_cast %191 : vector<1x1x32xf32> to vector<1x32xf32>
    %193 = vector.broadcast %192 : vector<1x32xf32> to vector<16x32xf32>
    %194 = arith.addf %190, %193 : vector<16x32xf32>
    %c1_73 = arith.constant 1 : index
    %c0_74 = arith.constant 0 : index
    %c0_75 = arith.constant 0 : index
    %195 = vector.load %arg5[%c1_73, %c0_74, %c0_75] : memref<2x8x96xf32, #tpu.memory_space<vmem>>, vector<1x1x32xf32>
    %196 = vector.shape_cast %195 : vector<1x1x32xf32> to vector<1x32xf32>
    %c1_76 = arith.constant 1 : index
    %c1_77 = arith.constant 1 : index
    %c0_78 = arith.constant 0 : index
    %197 = vector.load %arg5[%c1_76, %c1_77, %c0_78] : memref<2x8x96xf32, #tpu.memory_space<vmem>>, vector<1x1x32xf32>
    %198 = vector.shape_cast %197 : vector<1x1x32xf32> to vector<1x32xf32>
    %cst_79 = arith.constant dense<0.000000e+00> : vector<16xf32>
    %199 = vector.multi_reduction <add>, %194, %cst_79 [1] : vector<16x32xf32> to vector<16xf32>
    %200 = vector.shape_cast %199 : vector<16xf32> to vector<16x1xf32>
    %cst_80 = arith.constant 3.200000e+01 : f32
    %201 = vector.broadcast %cst_80 : f32 to vector<16x1xf32>
    %202 = arith.divf %200, %201 : vector<16x1xf32>
    %203 = vector.broadcast %202 : vector<16x1xf32> to vector<16x32xf32>
    %204 = arith.subf %194, %203 : vector<16x32xf32>
    %205 = arith.mulf %204, %204 : vector<16x32xf32>
    %cst_81 = arith.constant dense<0.000000e+00> : vector<16xf32>
    %206 = vector.multi_reduction <add>, %205, %cst_81 [1] : vector<16x32xf32> to vector<16xf32>
    %207 = vector.shape_cast %206 : vector<16xf32> to vector<16x1xf32>
    %cst_82 = arith.constant 3.200000e+01 : f32
    %208 = vector.broadcast %cst_82 : f32 to vector<16x1xf32>
    %209 = arith.divf %207, %208 : vector<16x1xf32>
    %cst_83 = arith.constant 9.99999997E-7 : f32
    %210 = vector.broadcast %cst_83 : f32 to vector<16x1xf32>
    %211 = arith.addf %209, %210 : vector<16x1xf32>
    %212 = math.rsqrt %211 : vector<16x1xf32>
    %213 = vector.broadcast %212 : vector<16x1xf32> to vector<16x32xf32>
    %214 = arith.mulf %204, %213 : vector<16x32xf32>
    %215 = vector.broadcast %196 : vector<1x32xf32> to vector<16x32xf32>
    %216 = arith.mulf %214, %215 : vector<16x32xf32>
    %217 = vector.broadcast %198 : vector<1x32xf32> to vector<16x32xf32>
    %218 = arith.addf %216, %217 : vector<16x32xf32>
    %c1_84 = arith.constant 1 : index
    %c0_85 = arith.constant 0 : index
    %c0_86 = arith.constant 0 : index
    %219 = vector.load %arg3[%c1_84, %c0_85, %c0_86] : memref<2x32x192xf32, #tpu.memory_space<vmem>>, vector<1x32x96xf32>
    %220 = vector.shape_cast %219 : vector<1x32x96xf32> to vector<32x96xf32>
    %cst_87 = arith.constant dense<0.000000e+00> : vector<16x96xf32>
    %221 = tpu.matmul %218, %220, %cst_87 {dimension_numbers = #tpu.dot_dimension_numbers<[1], [0], [0], [1], [0, 0, 1, 1], [], []>} : vector<16x32xf32>, vector<32x96xf32>, vector<16x96xf32> -> vector<16x96xf32>
    %c1_88 = arith.constant 1 : index
    %c2_89 = arith.constant 2 : index
    %c0_90 = arith.constant 0 : index
    %222 = vector.load %arg5[%c1_88, %c2_89, %c0_90] : memref<2x8x96xf32, #tpu.memory_space<vmem>>, vector<1x1x96xf32>
    %223 = vector.shape_cast %222 : vector<1x1x96xf32> to vector<1x96xf32>
    %224 = vector.broadcast %223 : vector<1x96xf32> to vector<16x96xf32>
    %225 = arith.addf %221, %224 : vector<16x96xf32>
    %226 = vector.extract_strided_slice %225 {offsets = [0, 0], sizes = [16, 8], strides = [1, 1]} : vector<16x96xf32> to vector<16x8xf32>
    %227 = vector.extract_strided_slice %225 {offsets = [0, 8], sizes = [16, 8], strides = [1, 1]} : vector<16x96xf32> to vector<16x8xf32>
    %228 = vector.extract_strided_slice %225 {offsets = [0, 16], sizes = [16, 8], strides = [1, 1]} : vector<16x96xf32> to vector<16x8xf32>
    %229 = vector.extract_strided_slice %225 {offsets = [0, 24], sizes = [16, 8], strides = [1, 1]} : vector<16x96xf32> to vector<16x8xf32>
    %230 = tpu.concatenate %226, %227, %228, %229 in 0 : vector<16x8xf32>, vector<16x8xf32>, vector<16x8xf32>, vector<16x8xf32> -> vector<64x8xf32>
    %231 = vector.extract_strided_slice %225 {offsets = [0, 32], sizes = [16, 8], strides = [1, 1]} : vector<16x96xf32> to vector<16x8xf32>
    %232 = vector.extract_strided_slice %225 {offsets = [0, 40], sizes = [16, 8], strides = [1, 1]} : vector<16x96xf32> to vector<16x8xf32>
    %233 = vector.extract_strided_slice %225 {offsets = [0, 48], sizes = [16, 8], strides = [1, 1]} : vector<16x96xf32> to vector<16x8xf32>
    %234 = vector.extract_strided_slice %225 {offsets = [0, 56], sizes = [16, 8], strides = [1, 1]} : vector<16x96xf32> to vector<16x8xf32>
    %235 = tpu.concatenate %231, %232, %233, %234 in 0 : vector<16x8xf32>, vector<16x8xf32>, vector<16x8xf32>, vector<16x8xf32> -> vector<64x8xf32>
    %236 = vector.extract_strided_slice %225 {offsets = [0, 64], sizes = [16, 8], strides = [1, 1]} : vector<16x96xf32> to vector<16x8xf32>
    %237 = vector.extract_strided_slice %225 {offsets = [0, 72], sizes = [16, 8], strides = [1, 1]} : vector<16x96xf32> to vector<16x8xf32>
    %238 = vector.extract_strided_slice %225 {offsets = [0, 80], sizes = [16, 8], strides = [1, 1]} : vector<16x96xf32> to vector<16x8xf32>
    %239 = vector.extract_strided_slice %225 {offsets = [0, 88], sizes = [16, 8], strides = [1, 1]} : vector<16x96xf32> to vector<16x8xf32>
    %240 = tpu.concatenate %236, %237, %238, %239 in 0 : vector<16x8xf32>, vector<16x8xf32>, vector<16x8xf32>, vector<16x8xf32> -> vector<64x8xf32>
    %cst_91 = arith.constant dense<0.000000e+00> : vector<64x64xf32>
    %241 = tpu.matmul %230, %235, %cst_91 {dimension_numbers = #tpu.dot_dimension_numbers<[1], [1], [0], [0], [0, 0, 1, 0], [], []>} : vector<64x8xf32>, vector<64x8xf32>, vector<64x64xf32> -> vector<64x64xf32>
    %cst_92 = arith.constant 0.353553385 : f32
    %242 = vector.broadcast %cst_92 : f32 to vector<64x64xf32>
    %243 = arith.mulf %241, %242 : vector<64x64xf32>
    %cst_93 = arith.constant -1.000000e+30 : f32
    %244 = vector.broadcast %cst_93 : f32 to vector<64x64xf32>
    %245 = arith.select %36, %243, %244 : vector<64x64xi1>, vector<64x64xf32>
    %cst_94 = arith.constant dense<0xFF800000> : vector<64xf32>
    %246 = vector.multi_reduction <maximumf>, %245, %cst_94 [1] : vector<64x64xf32> to vector<64xf32>
    %247 = vector.shape_cast %246 : vector<64xf32> to vector<64x1xf32>
    %248 = vector.broadcast %247 : vector<64x1xf32> to vector<64x64xf32>
    %249 = arith.subf %245, %248 : vector<64x64xf32>
    %250 = math.exp %249 : vector<64x64xf32>
    %cst_95 = arith.constant dense<0.000000e+00> : vector<64xf32>
    %251 = vector.multi_reduction <add>, %250, %cst_95 [1] : vector<64x64xf32> to vector<64xf32>
    %252 = vector.shape_cast %251 : vector<64xf32> to vector<64x1xf32>
    %253 = tpu.reciprocal %252 {approx = true} : vector<64x1xf32> -> vector<64x1xf32>
    %254 = vector.broadcast %253 : vector<64x1xf32> to vector<64x64xf32>
    %255 = arith.mulf %250, %254 : vector<64x64xf32>
    %cst_96 = arith.constant dense<0.000000e+00> : vector<64x8xf32>
    %256 = tpu.matmul %255, %240, %cst_96 {dimension_numbers = #tpu.dot_dimension_numbers<[1], [0], [0], [1], [0, 0, 1, 1], [], []>} : vector<64x64xf32>, vector<64x8xf32>, vector<64x8xf32> -> vector<64x8xf32>
    %257 = vector.extract_strided_slice %256 {offsets = [0, 0], sizes = [16, 8], strides = [1, 1]} : vector<64x8xf32> to vector<16x8xf32>
    %258 = vector.extract_strided_slice %256 {offsets = [16, 0], sizes = [16, 8], strides = [1, 1]} : vector<64x8xf32> to vector<16x8xf32>
    %259 = vector.extract_strided_slice %256 {offsets = [32, 0], sizes = [16, 8], strides = [1, 1]} : vector<64x8xf32> to vector<16x8xf32>
    %260 = vector.extract_strided_slice %256 {offsets = [48, 0], sizes = [16, 8], strides = [1, 1]} : vector<64x8xf32> to vector<16x8xf32>
    %261 = tpu.concatenate %257, %258, %259, %260 in 1 : vector<16x8xf32>, vector<16x8xf32>, vector<16x8xf32>, vector<16x8xf32> -> vector<16x32xf32>
    %c1_97 = arith.constant 1 : index
    %c0_98 = arith.constant 0 : index
    %c96_99 = arith.constant 96 : index
    %262 = vector.load %arg3[%c1_97, %c0_98, %c96_99] : memref<2x32x192xf32, #tpu.memory_space<vmem>>, vector<1x32x32xf32>
    %263 = vector.shape_cast %262 : vector<1x32x32xf32> to vector<32x32xf32>
    %cst_100 = arith.constant dense<0.000000e+00> : vector<16x32xf32>
    %264 = tpu.matmul %261, %263, %cst_100 {dimension_numbers = #tpu.dot_dimension_numbers<[1], [0], [0], [1], [0, 0, 1, 1], [], []>} : vector<16x32xf32>, vector<32x32xf32>, vector<16x32xf32> -> vector<16x32xf32>
    %265 = arith.addf %194, %264 : vector<16x32xf32>
    %c1_101 = arith.constant 1 : index
    %c3_102 = arith.constant 3 : index
    %c0_103 = arith.constant 0 : index
    %266 = vector.load %arg5[%c1_101, %c3_102, %c0_103] : memref<2x8x96xf32, #tpu.memory_space<vmem>>, vector<1x1x32xf32>
    %267 = vector.shape_cast %266 : vector<1x1x32xf32> to vector<1x32xf32>
    %268 = vector.broadcast %267 : vector<1x32xf32> to vector<16x32xf32>
    %269 = arith.addf %265, %268 : vector<16x32xf32>
    %c1_104 = arith.constant 1 : index
    %c4_105 = arith.constant 4 : index
    %c0_106 = arith.constant 0 : index
    %270 = vector.load %arg5[%c1_104, %c4_105, %c0_106] : memref<2x8x96xf32, #tpu.memory_space<vmem>>, vector<1x1x32xf32>
    %271 = vector.shape_cast %270 : vector<1x1x32xf32> to vector<1x32xf32>
    %c1_107 = arith.constant 1 : index
    %c5_108 = arith.constant 5 : index
    %c0_109 = arith.constant 0 : index
    %272 = vector.load %arg5[%c1_107, %c5_108, %c0_109] : memref<2x8x96xf32, #tpu.memory_space<vmem>>, vector<1x1x32xf32>
    %273 = vector.shape_cast %272 : vector<1x1x32xf32> to vector<1x32xf32>
    %cst_110 = arith.constant dense<0.000000e+00> : vector<16xf32>
    %274 = vector.multi_reduction <add>, %269, %cst_110 [1] : vector<16x32xf32> to vector<16xf32>
    %275 = vector.shape_cast %274 : vector<16xf32> to vector<16x1xf32>
    %cst_111 = arith.constant 3.200000e+01 : f32
    %276 = vector.broadcast %cst_111 : f32 to vector<16x1xf32>
    %277 = arith.divf %275, %276 : vector<16x1xf32>
    %278 = vector.broadcast %277 : vector<16x1xf32> to vector<16x32xf32>
    %279 = arith.subf %269, %278 : vector<16x32xf32>
    %280 = arith.mulf %279, %279 : vector<16x32xf32>
    %cst_112 = arith.constant dense<0.000000e+00> : vector<16xf32>
    %281 = vector.multi_reduction <add>, %280, %cst_112 [1] : vector<16x32xf32> to vector<16xf32>
    %282 = vector.shape_cast %281 : vector<16xf32> to vector<16x1xf32>
    %cst_113 = arith.constant 3.200000e+01 : f32
    %283 = vector.broadcast %cst_113 : f32 to vector<16x1xf32>
    %284 = arith.divf %282, %283 : vector<16x1xf32>
    %cst_114 = arith.constant 9.99999997E-7 : f32
    %285 = vector.broadcast %cst_114 : f32 to vector<16x1xf32>
    %286 = arith.addf %284, %285 : vector<16x1xf32>
    %287 = math.rsqrt %286 : vector<16x1xf32>
    %288 = vector.broadcast %287 : vector<16x1xf32> to vector<16x32xf32>
    %289 = arith.mulf %279, %288 : vector<16x32xf32>
    %290 = vector.broadcast %271 : vector<1x32xf32> to vector<16x32xf32>
    %291 = arith.mulf %289, %290 : vector<16x32xf32>
    %292 = vector.broadcast %273 : vector<1x32xf32> to vector<16x32xf32>
    %293 = arith.addf %291, %292 : vector<16x32xf32>
    %c1_115 = arith.constant 1 : index
    %c0_116 = arith.constant 0 : index
    %c128_117 = arith.constant 128 : index
    %294 = vector.load %arg3[%c1_115, %c0_116, %c128_117] : memref<2x32x192xf32, #tpu.memory_space<vmem>>, vector<1x32x64xf32>
    %295 = vector.shape_cast %294 : vector<1x32x64xf32> to vector<32x64xf32>
    %cst_118 = arith.constant dense<0.000000e+00> : vector<16x64xf32>
    %296 = tpu.matmul %293, %295, %cst_118 {dimension_numbers = #tpu.dot_dimension_numbers<[1], [0], [0], [1], [0, 0, 1, 1], [], []>} : vector<16x32xf32>, vector<32x64xf32>, vector<16x64xf32> -> vector<16x64xf32>
    %c1_119 = arith.constant 1 : index
    %c6_120 = arith.constant 6 : index
    %c0_121 = arith.constant 0 : index
    %297 = vector.load %arg5[%c1_119, %c6_120, %c0_121] : memref<2x8x96xf32, #tpu.memory_space<vmem>>, vector<1x1x64xf32>
    %298 = vector.shape_cast %297 : vector<1x1x64xf32> to vector<1x64xf32>
    %299 = vector.broadcast %298 : vector<1x64xf32> to vector<16x64xf32>
    %300 = arith.addf %296, %299 : vector<16x64xf32>
    %cst_122 = arith.constant 5.000000e-01 : f32
    %301 = vector.broadcast %cst_122 : f32 to vector<16x64xf32>
    %302 = arith.mulf %301, %300 : vector<16x64xf32>
    %cst_123 = arith.constant 0.707106769 : f32
    %303 = vector.broadcast %cst_123 : f32 to vector<16x64xf32>
    %304 = arith.mulf %300, %303 : vector<16x64xf32>
    %cst_124 = arith.constant 0.000000e+00 : f32
    %305 = vector.broadcast %cst_124 : f32 to vector<16x64xf32>
    %306 = arith.cmpf oge, %304, %305 : vector<16x64xf32>
    %cst_125 = arith.constant 1.000000e+00 : f32
    %cst_126 = arith.constant -1.000000e+00 : f32
    %307 = vector.broadcast %cst_125 : f32 to vector<16x64xf32>
    %308 = vector.broadcast %cst_126 : f32 to vector<16x64xf32>
    %309 = arith.select %306, %307, %308 : vector<16x64xi1>, vector<16x64xf32>
    %310 = math.absf %304 : vector<16x64xf32>
    %cst_127 = arith.constant 0.327591091 : f32
    %311 = vector.broadcast %cst_127 : f32 to vector<16x64xf32>
    %312 = arith.mulf %311, %310 : vector<16x64xf32>
    %cst_128 = arith.constant 1.000000e+00 : f32
    %313 = vector.broadcast %cst_128 : f32 to vector<16x64xf32>
    %314 = arith.addf %313, %312 : vector<16x64xf32>
    %315 = tpu.reciprocal %314 {approx = true} : vector<16x64xf32> -> vector<16x64xf32>
    %316 = arith.mulf %314, %315 : vector<16x64xf32>
    %cst_129 = arith.constant 2.000000e+00 : f32
    %317 = vector.broadcast %cst_129 : f32 to vector<16x64xf32>
    %318 = arith.subf %317, %316 : vector<16x64xf32>
    %319 = arith.mulf %315, %318 : vector<16x64xf32>
    %cst_130 = arith.constant 1.06140542 : f32
    %320 = vector.broadcast %cst_130 : f32 to vector<16x64xf32>
    %321 = arith.mulf %320, %319 : vector<16x64xf32>
    %cst_131 = arith.constant -1.45315206 : f32
    %322 = vector.broadcast %cst_131 : f32 to vector<16x64xf32>
    %323 = arith.addf %321, %322 : vector<16x64xf32>
    %324 = arith.mulf %323, %319 : vector<16x64xf32>
    %cst_132 = arith.constant 1.42141378 : f32
    %325 = vector.broadcast %cst_132 : f32 to vector<16x64xf32>
    %326 = arith.addf %324, %325 : vector<16x64xf32>
    %327 = arith.mulf %326, %319 : vector<16x64xf32>
    %cst_133 = arith.constant -0.284496725 : f32
    %328 = vector.broadcast %cst_133 : f32 to vector<16x64xf32>
    %329 = arith.addf %327, %328 : vector<16x64xf32>
    %330 = arith.mulf %329, %319 : vector<16x64xf32>
    %cst_134 = arith.constant 0.254829586 : f32
    %331 = vector.broadcast %cst_134 : f32 to vector<16x64xf32>
    %332 = arith.addf %330, %331 : vector<16x64xf32>
    %333 = arith.mulf %332, %319 : vector<16x64xf32>
    %cst_135 = arith.constant 0.000000e+00 : f32
    %334 = vector.broadcast %cst_135 : f32 to vector<16x64xf32>
    %335 = arith.subf %334, %310 : vector<16x64xf32>
    %336 = arith.mulf %335, %310 : vector<16x64xf32>
    %337 = math.exp %336 : vector<16x64xf32>
    %338 = arith.mulf %333, %337 : vector<16x64xf32>
    %cst_136 = arith.constant 1.000000e+00 : f32
    %339 = vector.broadcast %cst_136 : f32 to vector<16x64xf32>
    %340 = arith.subf %339, %338 : vector<16x64xf32>
    %341 = arith.mulf %309, %340 : vector<16x64xf32>
    %cst_137 = arith.constant 1.000000e+00 : f32
    %342 = vector.broadcast %cst_137 : f32 to vector<16x64xf32>
    %343 = arith.addf %342, %341 : vector<16x64xf32>
    %344 = arith.mulf %302, %343 : vector<16x64xf32>
    %c1_138 = arith.constant 1 : index
    %c0_139 = arith.constant 0 : index
    %c0_140 = arith.constant 0 : index
    %345 = vector.load %arg4[%c1_138, %c0_139, %c0_140] : memref<2x64x32xf32, #tpu.memory_space<vmem>>, vector<1x64x32xf32>
    %346 = vector.shape_cast %345 : vector<1x64x32xf32> to vector<64x32xf32>
    %cst_141 = arith.constant dense<0.000000e+00> : vector<16x32xf32>
    %347 = tpu.matmul %344, %346, %cst_141 {dimension_numbers = #tpu.dot_dimension_numbers<[1], [0], [0], [1], [0, 0, 1, 1], [], []>} : vector<16x64xf32>, vector<64x32xf32>, vector<16x32xf32> -> vector<16x32xf32>
    %348 = arith.addf %269, %347 : vector<16x32xf32>
    %c1_142 = arith.constant 1 : index
    %c7_143 = arith.constant 7 : index
    %c0_144 = arith.constant 0 : index
    %349 = vector.load %arg5[%c1_142, %c7_143, %c0_144] : memref<2x8x96xf32, #tpu.memory_space<vmem>>, vector<1x1x32xf32>
    %350 = vector.shape_cast %349 : vector<1x1x32xf32> to vector<1x32xf32>
    %351 = vector.broadcast %350 : vector<1x32xf32> to vector<16x32xf32>
    %352 = arith.addf %348, %351 : vector<16x32xf32>
    %353 = vector.extract_strided_slice %352 {offsets = [0, 0], sizes = [1, 32], strides = [1, 1]} : vector<16x32xf32> to vector<1x32xf32>
    %354 = vector.extract_strided_slice %352 {offsets = [8, 0], sizes = [1, 32], strides = [1, 1]} : vector<16x32xf32> to vector<1x32xf32>
    %355 = tpu.concatenate %353, %354 in 0 : vector<1x32xf32>, vector<1x32xf32> -> vector<2x32xf32>
    %c194 = arith.constant 194 : index
    %c0_145 = arith.constant 0 : index
    %356 = vector.load %arg2[%c194, %c0_145] : memref<248x32xf32, #tpu.memory_space<vmem>>, vector<1x32xf32>
    %c195 = arith.constant 195 : index
    %c0_146 = arith.constant 0 : index
    %357 = vector.load %arg2[%c195, %c0_146] : memref<248x32xf32, #tpu.memory_space<vmem>>, vector<1x32xf32>
    %cst_147 = arith.constant dense<0.000000e+00> : vector<2xf32>
    %358 = vector.multi_reduction <add>, %355, %cst_147 [1] : vector<2x32xf32> to vector<2xf32>
    %359 = vector.shape_cast %358 : vector<2xf32> to vector<2x1xf32>
    %cst_148 = arith.constant 3.200000e+01 : f32
    %360 = vector.broadcast %cst_148 : f32 to vector<2x1xf32>
    %361 = arith.divf %359, %360 : vector<2x1xf32>
    %362 = vector.broadcast %361 : vector<2x1xf32> to vector<2x32xf32>
    %363 = arith.subf %355, %362 : vector<2x32xf32>
    %364 = arith.mulf %363, %363 : vector<2x32xf32>
    %cst_149 = arith.constant dense<0.000000e+00> : vector<2xf32>
    %365 = vector.multi_reduction <add>, %364, %cst_149 [1] : vector<2x32xf32> to vector<2xf32>
    %366 = vector.shape_cast %365 : vector<2xf32> to vector<2x1xf32>
    %cst_150 = arith.constant 3.200000e+01 : f32
    %367 = vector.broadcast %cst_150 : f32 to vector<2x1xf32>
    %368 = arith.divf %366, %367 : vector<2x1xf32>
    %cst_151 = arith.constant 9.99999997E-7 : f32
    %369 = vector.broadcast %cst_151 : f32 to vector<2x1xf32>
    %370 = arith.addf %368, %369 : vector<2x1xf32>
    %371 = math.rsqrt %370 : vector<2x1xf32>
    %372 = vector.broadcast %371 : vector<2x1xf32> to vector<2x32xf32>
    %373 = arith.mulf %363, %372 : vector<2x32xf32>
    %374 = vector.broadcast %356 : vector<1x32xf32> to vector<2x32xf32>
    %375 = arith.mulf %373, %374 : vector<2x32xf32>
    %376 = vector.broadcast %357 : vector<1x32xf32> to vector<2x32xf32>
    %377 = arith.addf %375, %376 : vector<2x32xf32>
    %c216 = arith.constant 216 : index
    %c0_152 = arith.constant 0 : index
    %378 = vector.load %arg2[%c216, %c0_152] : memref<248x32xf32, #tpu.memory_space<vmem>>, vector<32x32xf32>
    %cst_153 = arith.constant dense<0.000000e+00> : vector<2x32xf32>
    %379 = tpu.matmul %377, %378, %cst_153 {dimension_numbers = #tpu.dot_dimension_numbers<[1], [0], [0], [1], [0, 0, 1, 1], [], []>} : vector<2x32xf32>, vector<32x32xf32>, vector<2x32xf32> -> vector<2x32xf32>
    %c196 = arith.constant 196 : index
    %c0_154 = arith.constant 0 : index
    %380 = vector.load %arg2[%c196, %c0_154] : memref<248x32xf32, #tpu.memory_space<vmem>>, vector<1x32xf32>
    %381 = vector.broadcast %380 : vector<1x32xf32> to vector<2x32xf32>
    %382 = arith.addf %379, %381 : vector<2x32xf32>
    %383 = vector.extract_strided_slice %382 {offsets = [0, 0], sizes = [2, 10], strides = [1, 1]} : vector<2x32xf32> to vector<2x10xf32>
    %c0_155 = arith.constant 0 : index
    %c0_156 = arith.constant 0 : index
    %384 = vector.load %arg6[%c0_155, %c0_156] : memref<2x10xf32, #tpu.memory_space<vmem>>, vector<2x10xf32>
    tpu.vector_store %arg6[%c0_155, %c0_156], %383 {strides = array<i32>} : memref<2x10xf32, #tpu.memory_space<vmem>>, vector<2x10xf32>,
    return
  }
  func.func @transform_0(%arg0: i32) -> (i32, i32) {
    %c0_i32 = arith.constant 0 : i32
    %c0_i32_0 = arith.constant 0 : i32
    %c0_i32_1 = arith.constant 0 : i32
    return %c0_i32, %c0_i32_0 : i32, i32
  }
  func.func @transform_1(%arg0: i32) -> (i32, i32) {
    %c0_i32 = arith.constant 0 : i32
    %c0_i32_0 = arith.constant 0 : i32
    %c0_i32_1 = arith.constant 0 : i32
    return %c0_i32, %c0_i32_0 : i32, i32
  }
  func.func @transform_2(%arg0: i32) -> (i32, i32, i32) {
    %c0_i32 = arith.constant 0 : i32
    %c0_i32_0 = arith.constant 0 : i32
    %c0_i32_1 = arith.constant 0 : i32
    %c0_i32_2 = arith.constant 0 : i32
    return %c0_i32, %c0_i32_0, %c0_i32_1 : i32, i32, i32
  }
  func.func @transform_3(%arg0: i32) -> (i32, i32, i32) {
    %c0_i32 = arith.constant 0 : i32
    %c0_i32_0 = arith.constant 0 : i32
    %c0_i32_1 = arith.constant 0 : i32
    %c0_i32_2 = arith.constant 0 : i32
    return %c0_i32, %c0_i32_0, %c0_i32_1 : i32, i32, i32
  }
  func.func @transform_4(%arg0: i32) -> (i32, i32, i32) {
    %c0_i32 = arith.constant 0 : i32
    %c0_i32_0 = arith.constant 0 : i32
    %c0_i32_1 = arith.constant 0 : i32
    %c0_i32_2 = arith.constant 0 : i32
    return %c0_i32, %c0_i32_0, %c0_i32_1 : i32, i32, i32
  }
  func.func @transform_5(%arg0: i32) -> (i32, i32) {
    %c0_i32 = arith.constant 0 : i32
    %c0_i32_0 = arith.constant 0 : i32
    %c0_i32_1 = arith.constant 0 : i32
    return %c0_i32, %c0_i32_0 : i32, i32
  }
}

</mosaic_0001>

<bundles_post_ra>
// kernel: vit_forward.1
= control target key start
LH: loop header
LB: loop body
LE: loop exit
PB: predicated region body
PF: predicated region fallthrough
CT: control target
= control target key end

     0   :  { %vm2787_vm0 = vcmask 523264   ;;  %s2777_s0 = inlined_call_operand.vmem [shape: f32[16,192], index: 0, kind: input, shape index: {}]   ;;  %s2778_s1 = inlined_call_operand.vmem [shape: f32[248,32], index: 1, kind: input, shape index: {}]   ;;  %s2779_s2 = inlined_call_operand.vmem [shape: f32[2,32,192], index: 2, kind: input, shape index: {}]   ;;  %s2780_s3 = inlined_call_operand.vmem [shape: f32[2,64,32], index: 3, kind: input, shape index: {}]   ;;  %s2781_s4 = inlined_call_operand.vmem [shape: f32[2,8,96], index: 4, kind: input, shape index: {}]   ;;  %s2782_s5 = inlined_call_operand.hbm [shape: f32[2,10], index: 5, kind: output, shape index: {}]  }
   0x1   :  { %v40_v0 = vld [vmem:[%s2778_s1 + $0x78] sm:$0xff]  ;;  %v39_v1 = vld [vmem:[%s2778_s1 + $0x70] sm:$0xff]  ;;  %v38_v2 = vld [vmem:[%s2778_s1 + $0x68] sm:$0xff] }
   0x2   :  { %58 = vmatpush.msra.mxu0 %v40_v0  ;;  %v48_v3 = vld [vmem:[%s2778_s1 + $0xb8] sm:$0xff]  ;;  %v47_v4 = vld [vmem:[%s2778_s1 + $0xb0] sm:$0xff]  ;;  %v37_v5 = vld [vmem:[%s2778_s1 + $0x60] sm:$0xff] }
   0x3   :  { %89 = vmatpush.msra.mxu3 %v48_v3  ;;  %v46_v6 = vld [vmem:[%s2778_s1 + $0xa8] sm:$0xff]  ;;  %v36_v7 = vld [vmem:[%s2778_s1 + $0x58] sm:$0xff]  ;;  %v45_v8 = vld [vmem:[%s2778_s1 + $0xa0] sm:$0xff] }
   0x4   :  { %59 = vmatpush.msra.mxu0 %v39_v1  ;;  %v35_v9 = vld [vmem:[%s2778_s1 + $0x50] sm:$0xff]  ;;  %v44_v10 = vld [vmem:[%s2778_s1 + $0x98] sm:$0xff]  ;;  %v34_v11 = vld [vmem:[%s2778_s1 + $0x48] sm:$0xff] }
   0x5   :  { %90 = vmatpush.msra.mxu3 %v47_v4  ;;  %v43_v12 = vld [vmem:[%s2778_s1 + $0x90] sm:$0xff]  ;;  %v33_v13 = vld [vmem:[%s2778_s1 + $0x40] sm:$0xff]  ;;  %v42_v14 = vld [vmem:[%s2778_s1 + $0x88] sm:$0xff] }
   0x6   :  { %60 = vmatpush.msra.mxu0 %v38_v2  ;;  %v32_v15 = vld [vmem:[%s2778_s1 + $0x38] sm:$0xff]  ;;  %v41_v16 = vld [vmem:[%s2778_s1 + $0x80] sm:$0xff]  ;;  %v22_v17 = vld [vmem:[%s2777_s0 + $0x8] sm:$0xff] }
   0x7   :  { %91 = vmatpush.msra.mxu3 %v46_v6  ;;  %v31_v18 = vld [vmem:[%s2778_s1 + $0x30] sm:$0xff] }
   0x8   :  { %61 = vmatpush.msra.mxu0 %v37_v5 }
   0x9   :  { %92 = vmatpush.msra.mxu3 %v45_v8 }
   0xa   :  { %62 = vmatpush.msra.mxu0 %v36_v7 }
   0xb   :  { %93 = vmatpush.msra.mxu3 %v44_v10 }
   0xc   :  { %63 = vmatpush.msra.mxu0 %v35_v9 }
   0xd   :  { %94 = vmatpush.msra.mxu3 %v43_v12 }
   0xe   :  { %64 = vmatpush.msra.mxu0 %v34_v11 }
   0xf   :  { %95 = vmatpush.msra.mxu3 %v42_v14 }
  0x10   :  { %65 = vmatpush.msra.mxu0 %v33_v13 }
  0x11   :  { %10 = vsyncpa [#allocation3], 0  ;;  %96 = vmatpush.msra.mxu3 %v41_v16  ;;  %v30_v19 = vld [vmem:[%s2778_s1 + $0x28] sm:$0xff]  ;;  %v29_v20 = vld [vmem:[%s2778_s1 + $0x20] sm:$0xff]  ;;  %v104_v28 = vlaneseq  ;;  %vm2786_vm3 = vcmask 261120   ;;  %v1890_v53 = vmov 32.0  }
  0x12   :  { %66 = vmatpush.msra.mxu0 %v32_v15  ;;  %1572 = vmatmul.msk.f32.vlgmr.msra.gmra.mxu3 %vm2787_vm0, %v22_v17  ;;  %v28_v21 = vld [vmem:[%s2778_s1 + $0x18] sm:$0xff]  ;;  %v27_v23 = vld [vmem:[%s2778_s1 + $0x10] sm:$0xff]  ;;  %v26_v24 = vld [vmem:[%s2778_s1 + $0x8] sm:$0xff]  ;;  %1764 = vrcp.f32 %v1890_v53  ;;  %s1891_s20 = smov 112   ;;  %s1892_s21 = smov 104   ;;  %vm2785_vm13 = vcmask 64512  }
  0x13   :  { %v24_v22 = vld [vmem:[%s2777_s0 + $0x18] sm:$0xff]  ;;  %v25_v25 = vld [vmem:[%s2778_s1] sm:$0xff]  ;;  %v23_v27 = vld [vmem:[%s2777_s0 + $0x10] sm:$0xff]  ;;  %v2019_v29 = vshrl.u32 %v104_v28, 7  ;;  %s1893_s22 = smov 120   ;;  %s1894_s23 = smov 96  }
  0x14   :  { %67 = vmatpush.msra.mxu0 %v31_v18  ;;  %v21_v26 = vld [vmem:[%s2777_s0] sm:$0xff]  ;;  %v127_v38 = vld [vmem:[%s2778_s1 + $0xc8] sm:$0xff]  ;;  %v128_v48 = vld [vmem:[%s2778_s1 + $0xd0] sm:$0xff]  ;;  %s1895_s24 = smov 64   ;;  %s1896_s25 = smov 32  }
  0x15   :  { %v1743_v30 = vld [vmem:[%s2778_s1 + $0xc0] ss:$0 sm:$0xff]  ;;  %v107_v32 = vand.u32 7, %v2019_v29  ;;  %v1744_v35 = vld [vmem:[%s2778_s1 + $0xc1] ss:$0 sm:$0xff]  ;;  %v2029_v36 = vadd.s32 8, %v2019_v29 }
  0x16   :  { %68 = vmatpush.msra.mxu0 %v30_v19  ;;  %v2057_v6 = vld [vmem:[%s2779_s2 + $0x30] sm:$0xff]  ;;  %v2063_v7 = vld [vmem:[%s2779_s2 + $0x20] sm:$0xff]  ;;  %s1897_s26 = smov 8   ;;  %s1898_s27 = smov 16  }
  0x17   :  { %vm110_vm1 = vcmp.eq.s32.totalorder %v107_v32, 0  ;;  %vm119_vm2 = vcmp.lt.s32.totalorder %v107_v32, 5  ;;  %v108_v40 = vand.u32 7, %v2029_v36  ;;  %257 = vmatpush.msra.mxu2 %v2057_v6  ;;  %v2069_v8 = vld [vmem:[%s2779_s2 + $0x10] sm:$0xff]  ;;  %v2075_v9 = vld [vmem:[%s2779_s2] sm:$0xff]  ;;  %v1703_v10 = vpack.i.bf16 %v2063_v7, %v2057_v6  ;;  %s1899_s0 = smov 24  }
  0x18   :  { %69 = vmatpush.msra.mxu0 %v29_v20  ;;  %v1765_v54 = vpop.eup %1764  ;;  %v1708_v11 = vpack.i.bf16 %v2075_v9, %v2069_v8  ;;  %v1746_v32 = vld [vmem:[%s2781_s4 + $0x1] ss:$0 sm:$0xff]  ;;  %s1901_s9 = smov [#allocation2]   ;;  %s1563_s13 = sshll.u32 %s2782_s5, 4  ;;  %s1564_s13 = int_to_ptr.hbm [resolvable:$true] %s1563_s13 }
  0x19   :  { %vm111_vm4 = vcmp.eq.s32.totalorder %v108_v40, 0  ;;  %vm120_vm5 = vcmp.lt.s32.totalorder %v108_v40, 5  ;;  %v183_v55 = vmul.f32 32.0, %v1765_v54  ;;  %vm187_vm6 = vweird.f32 %v1765_v54  ;;  %258 = vmatpush.msra.mxu2 %v2063_v7  ;;  %s1561_s10 = sshll.u32 %s1901_s9, 4  ;;  %s1562_s10 = int_to_ptr.vmem [resolvable:$true] %s1561_s10 }
  0x1a   :  { %70 = vmatpush.msra.mxu0 %v28_v21  ;;  %1573 = vmatmul.msk.f32.gmra.mxu3 %vm2787_vm0, %v24_v22 }
  0x1b   :  { %v184_v56 = vsub.f32 1.0, %v183_v55  ;;  %259 = vmatpush.msra.mxu2 %v2069_v8 }
  0x1c   :  { %71 = vmatpush.msra.mxu0 %v27_v23 }
  0x1d   :  { %v185_v57 = vmul.f32 %v1765_v54, %v184_v56  ;;  %260 = vmatpush.msra.mxu2 %v2075_v9 }
  0x1e   :  { %72 = vmatpush.msra.mxu0 %v26_v24 }
  0x1f   :  { %v186_v58 = vadd.f32 %v1765_v54, %v185_v57 }
  0x20   :  { %73 = vmatpush.msra.mxu0 %v25_v25 }
  0x21   :  { %74 = vmatmul.f32.vlgmr.msra.gmra.mxu0 %v21_v26  ;;  %v2046_v59 = vsel %vm187_vm6, %v1765_v54, %v186_v58  ;;  %v1745_v26 = vld [vmem:[%s2781_s4] ss:$0 sm:$0xff] }
  0x29   :  { %77 = vmatmul.f32.gmra.mxu0 %v23_v27 }
  0x95   :  { %v98_v31 = vpop.f32.mrf.mxu3 }
  0x9d   :  { %v101_v44 = vpop.f32.mrf.mxu3 }
  0x9e   :  { %v75_v33 = vpop.f32.mrf.mxu0 }
  0x9f   :  { %v76_v34 = vadd.f32 %v1743_v30, %v75_v33 }
  0xa1   :  { %v99_v37 = vadd.f32 %v98_v31, %v76_v34 }
  0xa3   :  { %v117_v39 = vsel %vm110_vm1, %v1744_v35, %v99_v37 }
  0xa4   :  { %v125_v41 = vsel %vm119_vm2, %v117_v39, 0.0 }
  0xa5   :  { %v2035_v42 = vadd.f32 %v127_v38, %v125_v41 }
  0xa6   :  { %v78_v43 = vpop.f32.mrf.mxu0 }
  0xa7   :  { %v79_v45 = vadd.f32 %v1743_v30, %v78_v43  ;;  %v176_v46 = vsel %vm2786_vm3, %v2035_v42, 0.0 }
  0xa8   :  { %177 = vadd.xlane.f32.xlu0 %v176_v46 }
  0xa9   :  { %v102_v47 = vadd.f32 %v101_v44, %v79_v45  ;;  %v1747_v44 = vld [vmem:[%s2781_s4 + $0x2] ss:$0 sm:$0xff] }
  0xab   :  { %v118_v49 = vsel %vm111_vm4, %v1744_v35, %v102_v47 }
  0xac   :  { %v126_v50 = vsel %vm120_vm5, %v118_v49, 0.0 }
  0xad   :  { %v2042_v51 = vadd.f32 %v128_v48, %v126_v50 }
  0xaf   :  { %v179_v52 = vsel %vm2786_vm3, %v2042_v51, 0.0 }
  0xb0   :  { %180 = vadd.xlane.f32.xlu0 %v179_v52 }
 0x11b   :  { %v178_v60 = vpop.xlane.xlu0 %177 }
 0x11c   :  { %v189_v61 = vmul.f32 %v2046_v59, %v178_v60 }
 0x11e   :  { %v191_v62 = vsub.f32 %v2035_v42, %v189_v61 }
 0x120   :  { %v193_v63 = vmul.f32 %v191_v62, %v191_v62 }
 0x122   :  { %v195_v0 = vsel %vm2786_vm3, %v193_v63, 0.0 }
 0x123   :  { %196 = vadd.xlane.f32.xlu1 %v195_v0  ;;  %v181_v1 = vpop.xlane.xlu0 %180 }
 0x124   :  { %v190_v2 = vmul.f32 %v2046_v59, %v181_v1  ;;  %v2164_v1 = vand.u32 127, %v104_v28 }
 0x126   :  { %v192_v3 = vsub.f32 %v2042_v51, %v190_v2  ;;  %v139_v2 = vxor.u32 %v2164_v1, %v2019_v29 }
 0x128   :  { %v194_v4 = vmul.f32 %v192_v3, %v192_v3 }
 0x12a   :  { %v198_v5 = vsel %vm2786_vm3, %v194_v4, 0.0  ;;  %v163_v4 = vand.u32 7, %v2164_v1 }
 0x12b   :  { %199 = vadd.xlane.f32.xlu1 %v198_v5 }
 0x12c   :  { %vm2169_vm15 = vcmp.lt.s32.totalorder %v163_v4, 5 }
 0x196   :  { %v197_v12 = vpop.xlane.xlu1 %196 }
 0x197   :  { %v201_v13 = vmul.f32 %v197_v12, %v2046_v59  ;;  %v140_v12 = vxor.u32 %v2164_v1, %v2029_v36  ;;  %v134_v36 = vadd.s32 40, %v2019_v29 }
 0x199   :  { %v203_v14 = vadd.f32 1e-06, %v201_v13 }
 0x19b   :  { %1766 = vrsqrt.f32 %v203_v14  ;;  %vm211_vm8 = vweird.f32 %v203_v14 }
 0x19e   :  { %v200_v15 = vpop.xlane.xlu1 %199 }
 0x19f   :  { %v202_v16 = vmul.f32 %v200_v15, %v2046_v59  ;;  %v148_v15 = vand.u32 4294967288, %v140_v12 }
 0x1a1   :  { %v1767_v17 = vpop.eup %1766  ;;  %v204_v18 = vadd.f32 1e-06, %v202_v16  ;;  %v131_v16 = vadd.s32 16, %v2019_v29  ;;  %vm156_vm2 = vcmp.eq.s32.totalorder %v148_v15, 0 }
 0x1a2   :  { %v206_v19 = vmul.f32 %v1767_v17, %v203_v14  ;;  %vm212_vm7 = vweird.f32 %v1767_v17  ;;  %vm2193_vm4 = vmand %vm156_vm2, %vm2169_vm15 }
 0x1a3   :  { %1768 = vrsqrt.f32 %v204_v18  ;;  %vm213_vm9 = vmor %vm211_vm8, %vm212_vm7  ;;  %vm221_vm11 = vweird.f32 %v204_v18 }
 0x1a4   :  { %v207_v20 = vmul.f32 %v1767_v17, %v206_v19  ;;  %v141_v19 = vxor.u32 %v2164_v1, %v131_v16 }
 0x1a6   :  { %v208_v21 = vmul.f32 0.5, %v207_v20  ;;  %v144_v20 = vxor.u32 %v2164_v1, %v134_v36 }
 0x1a8   :  { %v209_v22 = vsub.f32 1.5, %v208_v21 }
 0x1a9   :  { %v1769_v23 = vpop.eup %1768 }
 0x1aa   :  { %v210_v24 = vmul.f32 %v1767_v17, %v209_v22  ;;  %v216_v25 = vmul.f32 %v1769_v23, %v204_v18  ;;  %vm222_vm10 = vweird.f32 %v1769_v23 }
 0x1ab   :  { %vm223_vm12 = vmor %vm221_vm11, %vm222_vm10 }
 0x1ac   :  { %v214_v27 = vsel %vm213_vm9, %v1767_v17, %v210_v24  ;;  %v217_v30 = vmul.f32 %v1769_v23, %v216_v25  ;;  %v149_v25 = vand.u32 4294967288, %v141_v19 }
 0x1ad   :  { %v225_v31 = vmul.f32 %v214_v27, %v191_v62 }
 0x1ae   :  { %v218_v33 = vmul.f32 0.5, %v217_v30  ;;  %vm157_vm7 = vcmp.eq.s32.totalorder %v149_v25, 0 }
 0x1af   :  { %v228_v34 = vmul.f32 %v1745_v26, %v225_v31  ;;  %vm2213_vm8 = vmand %vm157_vm7, %vm2169_vm15 }
 0x1b0   :  { %v219_v35 = vsub.f32 1.5, %v218_v33 }
 0x1b1   :  { %v231_v37 = vadd.f32 %v1746_v32, %v228_v34 }
 0x1b2   :  { %v220_v38 = vmul.f32 %v1769_v23, %v219_v35 }
 0x1b3   :  { %1574 = vmatmul.msk.f32.vlgmr.msra.gmra.mxu2 %vm2786_vm3, %v231_v37 }
 0x1b4   :  { %v224_v39 = vsel %vm223_vm12, %v1769_v23, %v220_v38  ;;  %v152_v23 = vand.u32 4294967288, %v144_v20  ;;  %v133_v38 = vadd.s32 32, %v2019_v29 }
 0x1b5   :  { %v226_v40 = vmul.f32 %v224_v39, %v192_v3  ;;  %v147_v3 = vand.u32 4294967288, %v139_v2 }
 0x1b6   :  { %vm160_vm5 = vcmp.eq.s32.totalorder %v152_v23, 0 }
 0x1b7   :  { %v229_v41 = vmul.f32 %v1745_v26, %v226_v40  ;;  %vm155_vm14 = vcmp.eq.s32.totalorder %v147_v3, 0  ;;  %v132_v26 = vadd.s32 24, %v2019_v29  ;;  %vm2204_vm6 = vmand %vm160_vm5, %vm2169_vm15  ;;  %v135_v3 = vadd.s32 48, %v2019_v29 }
 0x1b8   :  { %vm2177_vm1 = vmand %vm155_vm14, %vm2169_vm15 }
 0x1b9   :  { %v232_v43 = vadd.f32 %v1746_v32, %v229_v41  ;;  %v142_v32 = vxor.u32 %v2164_v1, %v132_v26  ;;  %v136_v41 = vadd.s32 56, %v2019_v29 }
 0x1bb   :  { %1575 = vmatmul.msk.f32.gmra.mxu2 %vm2786_vm3, %v232_v43  ;;  %v150_v37 = vand.u32 4294967288, %v142_v32  ;;  %v143_v43 = vxor.u32 %v2164_v1, %v133_v38 }
 0x1bd   :  { %vm158_vm9 = vcmp.eq.s32.totalorder %v150_v37, 0 }
 0x1be   :  { %vm2229_vm10 = vmand %vm158_vm9, %vm2169_vm15  ;;  %vm2783_vm9 = vcmask 195584  }
 0x236   :  { %v262_v45 = vpop.f32.mrf.mxu2 }
 0x237   :  { %v2095_v46 = vadd.f32 %v1747_v44, %v262_v45 }
 0x239   :  { %274 = vrot.lane.b32.xlu1 %v2095_v46, %s1891_s20 }
 0x23e   :  { %v265_v47 = vpop.f32.mrf.mxu2 }
 0x23f   :  { %v2099_v48 = vadd.f32 %v1747_v44, %v265_v47  ;;  %v146_v44 = vxor.u32 %v2164_v1, %v136_v41 }
 0x241   :  { %276 = vrot.lane.b32.xlu0 %v2099_v48, %s1891_s20  ;;  %280 = vrot.lane.b32.xlu2 %v2099_v48, %s1892_s21 }
 0x249   :  { %278 = vrot.lane.b32.xlu2 %v2095_v46, %s1892_s21 }
 0x251   :  { %272 = vrot.lane.b32.xlu2 %v2099_v48, %s1893_s22 }
 0x259   :  { %270 = vrot.lane.b32.xlu2 %v2095_v46, %s1893_s22 }
 0x29b   :  { %v2111_v49 = vpop.permute.xlu2 %280 }
 0x29c   :  { %296 = vrot.lane.b32.xlu2 %v2111_v49, %s1894_s23 }
 0x2a3   :  { %v2115_v50 = vpop.permute.xlu2 %278 }
 0x2a4   :  { %294 = vrot.lane.b32.xlu0 %v2115_v50, %s1894_s23 }
 0x2ab   :  { %v2119_v52 = vpop.permute.xlu2 %272  ;;  %v2121_v53 = vpop.permute.xlu1 %274 }
 0x2ac   :  { %288 = vrot.lane.b32.xlu0 %v2119_v52, %s1894_s23  ;;  %290 = vrot.lane.b32.xlu1 %v2121_v53, %s1894_s23 }
 0x2b3   :  { %v2127_v54 = vpop.permute.xlu0 %276  ;;  %v2135_v55 = vpop.permute.xlu2 %270 }
 0x2b4   :  { %292 = vrot.lane.b32.xlu2 %v2127_v54, %s1894_s23  ;;  %282 = vrot.lane.b32.xlu0 %v2095_v46, %s1894_s23 }
 0x2b5   :  { %284 = vrot.lane.b32.xlu1 %v2099_v48, %s1894_s23 }
 0x2bc   :  { %286 = vrot.lane.b32.xlu2 %v2135_v55, %s1894_s23 }
 0x2f6   :  { %v297_v56 = vpop.permute.xlu2 %296 }
 0x2f7   :  { %1576 = vmatpush.xpose.msk.msrb.mxu3 %vm2785_vm13, %v297_v56  ;;  %v154_v56 = vand.u32 4294967288, %v146_v44 }
 0x2f9   :  { %vm162_vm11 = vcmp.eq.s32.totalorder %v154_v56, 0 }
 0x2fa   :  { %vm2237_vm12 = vmand %vm162_vm11, %vm2169_vm15 }
 0x30e   :  { %v293_v58 = vpop.permute.xlu2 %292 }
 0x316   :  { %v295_v57 = vpop.permute.xlu0 %294  ;;  %v287_v62 = vpop.permute.xlu2 %286 }
 0x317   :  { %1577 = vmatpush.xpose.msk.msrb.mxu3 %vm2785_vm13, %v295_v57 }
 0x31b   :  { %1578 = vmatpush.xpose.msk.msrb.mxu3 %vm2785_vm13, %v293_v58  ;;  %v151_v58 = vand.u32 4294967288, %v143_v43 }
 0x31d   :  { %vm159_vm14 = vcmp.eq.s32.totalorder %v151_v58, 0 }
 0x31e   :  { %v291_v60 = vpop.permute.xlu1 %290  ;;  %v289_v61 = vpop.permute.xlu0 %288  ;;  %vm2244_vm2 = vmand %vm159_vm14, %vm2169_vm15 }
 0x31f   :  { %1579 = vmatpush.xpose.msk.msrb.mxu3 %vm2785_vm13, %v291_v60 }
 0x323   :  { %1580 = vmatpush.xpose.msk.msrb.mxu3 %vm2785_vm13, %v289_v61 }
 0x326   :  { %v283_v0 = vpop.permute.xlu0 %282 }
 0x327   :  { %1581 = vmatpush.xpose.msk.msrb.mxu3 %vm2785_vm13, %v287_v62  ;;  %v285_v63 = vpop.permute.xlu1 %284 }
 0x32b   :  { %1582 = vmatpush.xpose.msk.msrb.mxu3 %vm2785_vm13, %v285_v63 }
 0x32f   :  { %1583 = vmatpush.xpose.msk.msrb.mxu3 %vm2785_vm13, %v283_v0 }
 0x332   :  { %1584 = vmatmul.msk.f32.vlgmr.msrb.gmra.mxu3 %vm2785_vm13, %v2095_v46 }
 0x33a   :  { %1585 = vmatmul.msk.f32.gmra.mxu3 %vm2785_vm13, %v2099_v48 }
 0x342   :  { %1586 = vmatmul.msk.f32.gmra.mxu3 %vm2785_vm13, %v2135_v55 }
 0x34a   :  { %1587 = vmatmul.msk.f32.gmra.mxu3 %vm2785_vm13, %v2119_v52 }
 0x352   :  { %1588 = vmatmul.msk.f32.gmra.mxu3 %vm2785_vm13, %v2121_v53 }
 0x35a   :  { %1589 = vmatmul.msk.f32.gmra.mxu3 %vm2785_vm13, %v2127_v54 }
 0x362   :  { %1590 = vmatmul.msk.f32.gmra.mxu3 %vm2785_vm13, %v2115_v50 }
 0x36a   :  { %1591 = vmatmul.msk.f32.gmra.mxu3 %vm2785_vm13, %v2111_v49 }
 0x3b5   :  { %v348_v13 = vpop.f32.mrf.mxu3 }
 0x3b6   :  { %v372_v14 = vmul.f32 0.35355338, %v348_v13  ;;  %v145_v13 = vxor.u32 %v2164_v1, %v135_v3  ;;  %v1683_v1 = vpack.i.bf16 %v2115_v50, %v2111_v49 }
 0x3b8   :  { %v2184_v17 = vsel %vm2177_vm1, %v372_v14, -1e+30  ;;  %v1688_v14 = vpack.i.bf16 %v2121_v53, %v2127_v54  ;;  %v153_v16 = vand.u32 4294967288, %v145_v13 }
 0x3b9   :  { %v388_v18 = vsel %vm2787_vm0, %v2184_v17, -inf }
 0x3ba   :  { %389 = vmax.xlane.f32.xlu2 %v388_v18  ;;  %vm161_vm5 = vcmp.eq.s32.totalorder %v153_v16, 0 }
 0x3bb   :  { %vm2258_vm7 = vmand %vm161_vm5, %vm2169_vm15  ;;  %vm2784_vm15 = vcmask 130048  }
 0x3bd   :  { %v351_v21 = vpop.f32.mrf.mxu3 }
 0x3be   :  { %v373_v24 = vmul.f32 0.35355338, %v351_v21 }
 0x3c0   :  { %v2200_v27 = vsel %vm2193_vm4, %v373_v24, -1e+30  ;;  %v1698_v24 = vpack.i.bf16 %v2095_v46, %v2099_v48 }
 0x3c1   :  { %v391_v31 = vsel %vm2787_vm0, %v2200_v27, -inf }
 0x3c2   :  { %392 = vmax.xlane.f32.xlu1 %v391_v31 }
 0x3c5   :  { %v354_v33 = vpop.f32.mrf.mxu3 }
 0x3c6   :  { %v374_v35 = vmul.f32 0.35355338, %v354_v33 }
 0x3c8   :  { %v2220_v39 = vsel %vm2213_vm8, %v374_v35, -1e+30 }
 0x3c9   :  { %v394_v40 = vsel %vm2787_vm0, %v2220_v39, -inf }
 0x3ca   :  { %395 = vmax.xlane.f32.xlu0 %v394_v40 }
 0x3cd   :  { %v357_v45 = vpop.f32.mrf.mxu3 }
 0x3ce   :  { %v375_v57 = vmul.f32 0.35355338, %v357_v45 }
 0x3d0   :  { %v383_v60 = vsel %vm2229_vm10, %v375_v57, -1e+30 }
 0x3d1   :  { %v397_v62 = vsel %vm2787_vm0, %v383_v60, -inf }
 0x3d2   :  { %398 = vmax.xlane.f32.xlu2 %v397_v62 }
 0x3d5   :  { %v360_v63 = vpop.f32.mrf.mxu3 }
 0x3d6   :  { %v376_v2 = vmul.f32 0.35355338, %v360_v63 }
 0x3d8   :  { %v384_v4 = vsel %vm2244_vm2, %v376_v2, -1e+30  ;;  %v1693_v2 = vpack.i.bf16 %v2135_v55, %v2119_v52 }
 0x3d9   :  { %v400_v12 = vsel %vm2787_vm0, %v384_v4, -inf }
 0x3da   :  { %401 = vmax.xlane.f32.xlu1 %v400_v12 }
 0x3dd   :  { %v363_v15 = vpop.f32.mrf.mxu3 }
 0x3de   :  { %1689 = vrot.lane.b32.xlu0 %v1688_v14, %s1895_s24  ;;  %v377_v19 = vmul.f32 0.35355338, %v363_v15 }
 0x3e0   :  { %v2270_v5 = vsel %vm2204_vm6, %v377_v19, -1e+30 }
 0x3e1   :  { %v403_v20 = vsel %vm2787_vm0, %v2270_v5, -inf }
 0x3e5   :  { %v366_v18 = vpop.f32.mrf.mxu3 }
 0x3e6   :  { %v378_v36 = vmul.f32 0.35355338, %v366_v18 }
 0x3e8   :  { %v386_v53 = vsel %vm2258_vm7, %v378_v36, -1e+30 }
 0x3e9   :  { %v406_v54 = vsel %vm2787_vm0, %v386_v53, -inf }
 0x3ea   :  { %1684 = vrot.lane.b32.xlu2 %v1683_v1, %s1895_s24  ;;  %407 = vmax.xlane.f32.xlu1 %v406_v54 }
 0x3ed   :  { %v369_v21 = vpop.f32.mrf.mxu3 }
 0x3ee   :  { %v379_v23 = vmul.f32 0.35355338, %v369_v21 }
 0x3f0   :  { %v2276_v49 = vsel %vm2237_vm12, %v379_v23, -1e+30 }
 0x3f1   :  { %v409_v50 = vsel %vm2787_vm0, %v2276_v49, -inf }
 0x408   :  { %404 = vmax.xlane.f32.xlu0 %v403_v20 }
 0x413   :  { %410 = vmax.xlane.f32.xlu2 %v409_v50 }
 0x41c   :  { %1699 = vrot.lane.b32.xlu0 %v1698_v24, %s1895_s24 }
 0x42d   :  { %v390_v25 = vpop.xlane.xlu2 %389 }
 0x42e   :  { %v412_v26 = vsub.f32 %v2184_v17, %v390_v25 }
 0x430   :  { %v420_v31 = vmul.f32 1.442695, %v412_v26 }
 0x432   :  { %1770 = vpow2.f32 %v420_v31 }
 0x435   :  { %v393_v32 = vpop.xlane.xlu1 %392 }
 0x436   :  { %v413_v33 = vsub.f32 %v2200_v27, %v393_v32 }
 0x438   :  { %v2285_v35 = vpop.eup %1770  ;;  %v422_v37 = vmul.f32 1.442695, %v413_v33 }
 0x439   :  { %v436_v38 = vsel %vm2787_vm0, %v2285_v35, 0.0 }
 0x43a   :  { %437 = vadd.xlane.f32.xlu1 %v436_v38  ;;  %1772 = vpow2.f32 %v422_v37 }
 0x43d   :  { %v396_v41 = vpop.xlane.xlu0 %395 }
 0x43e   :  { %v414_v18 = vsub.f32 %v2220_v39, %v396_v41 }
 0x440   :  { %v2289_v40 = vpop.eup %1772  ;;  %v424_v36 = vmul.f32 1.442695, %v414_v18 }
 0x441   :  { %v439_v48 = vsel %vm2787_vm0, %v2289_v40, 0.0 }
 0x445   :  { %v399_v46 = vpop.xlane.xlu2 %398 }
 0x446   :  { %v415_v17 = vsub.f32 %v383_v60, %v399_v46  ;;  %440 = vadd.xlane.f32.xlu0 %v439_v48 }
 0x448   :  { %v426_v43 = vmul.f32 1.442695, %v415_v17 }
 0x44a   :  { %1774 = vpow2.f32 %v426_v43 }
 0x44d   :  { %v1685_v27 = vpop.permute.xlu2 %1684  ;;  %v402_v44 = vpop.xlane.xlu1 %401 }
 0x44e   :  { %v416_v45 = vsub.f32 %v384_v4, %v402_v44  ;;  %v1686_v56 = vunpack.i.l.bf16 %v1685_v27  ;;  %v1687_v63 = vunpack.i.h.bf16 %v1685_v27 }
 0x450   :  { %v2293_v57 = vpop.eup %1774  ;;  %v428_v58 = vmul.f32 1.442695, %v416_v45  ;;  %v1690_v62 = vpop.permute.xlu0 %1689  ;;  %532 = vmatpush.msrb.mxu2 %v1686_v56 }
 0x451   :  { %v445_v60 = vsel %vm2787_vm0, %v2293_v57, 0.0  ;;  %v1691_v3 = vunpack.i.l.bf16 %v1690_v62  ;;  %v1692_v4 = vunpack.i.h.bf16 %v1690_v62 }
 0x452   :  { %1776 = vpow2.f32 %v428_v58  ;;  %533 = vmatpush.msrb.mxu2 %v1687_v63  ;;  %446 = vadd.xlane.f32.xlu2 %v445_v60 }
 0x453   :  { %1694 = vrot.lane.b32.xlu1 %v1693_v2, %s1895_s24 }
 0x454   :  { %534 = vmatpush.msrb.mxu2 %v1691_v3 }
 0x456   :  { %535 = vmatpush.msrb.mxu2 %v1692_v4 }
 0x458   :  { %v2300_v12 = vpop.eup %1776 }
 0x459   :  { %v448_v13 = vsel %vm2787_vm0, %v2300_v12, 0.0 }
 0x45a   :  { %449 = vadd.xlane.f32.xlu2 %v448_v13 }
 0x45d   :  { %v408_v14 = vpop.xlane.xlu1 %407 }
 0x45e   :  { %v418_v52 = vsub.f32 %v386_v53, %v408_v14 }
 0x460   :  { %v432_v55 = vmul.f32 1.442695, %v418_v52 }
 0x462   :  { %1778 = vpow2.f32 %v432_v55 }
 0x463   :  { %1780 = vpow2.f32 %v424_v36 }
 0x468   :  { %v2304_v15 = vpop.eup %1778 }
 0x469   :  { %v454_v16 = vsel %vm2787_vm0, %v2304_v15, 0.0  ;;  %v1781_v1 = vpop.eup %1780 }
 0x46a   :  { %455 = vadd.xlane.f32.xlu2 %v454_v16  ;;  %v442_v20 = vsel %vm2787_vm0, %v1781_v1, 0.0 }
 0x47b   :  { %v405_v54 = vpop.xlane.xlu0 %404 }
 0x47c   :  { %v417_v19 = vsub.f32 %v2270_v5, %v405_v54 }
 0x47d   :  { %443 = vadd.xlane.f32.xlu1 %v442_v20 }
 0x47e   :  { %v430_v53 = vmul.f32 1.442695, %v417_v19 }
 0x480   :  { %1782 = vpow2.f32 %v430_v53 }
 0x486   :  { %v1783_v21 = vpop.eup %1782  ;;  %v411_v23 = vpop.xlane.xlu2 %410 }
 0x487   :  { %v419_v50 = vsub.f32 %v2276_v49, %v411_v23  ;;  %v451_v24 = vsel %vm2787_vm0, %v1783_v21, 0.0 }
 0x488   :  { %452 = vadd.xlane.f32.xlu0 %v451_v24 }
 0x489   :  { %v434_v25 = vmul.f32 1.442695, %v419_v50 }
 0x48b   :  { %1784 = vpow2.f32 %v434_v25 }
 0x48e   :  { %v1700_v5 = vpop.permute.xlu0 %1699 }
 0x48f   :  { %v1701_v49 = vunpack.i.l.bf16 %v1700_v5  ;;  %v1702_v48 = vunpack.i.h.bf16 %v1700_v5 }
 0x491   :  { %v1785_v39 = vpop.eup %1784 }
 0x492   :  { %v457_v26 = vsel %vm2787_vm0, %v1785_v39, 0.0 }
 0x493   :  { %458 = vadd.xlane.f32.xlu0 %v457_v26 }
 0x496   :  { %1704 = vrot.lane.b32.xlu1 %v1703_v10, %s1896_s25 }
 0x4a7   :  { %1709 = vrot.lane.b32.xlu0 %v1708_v11, %s1896_s25 }
 0x4ad   :  { %v438_v31 = vpop.xlane.xlu1 %437 }
 0x4ae   :  { %1786 = vrcp.f32 %v438_v31 }
 0x4b4   :  { %v1787_v46 = vpop.eup %1786 }
 0x4b5   :  { %v468_v17 = vmul.f32 %v1787_v46, %v2285_v35 }
 0x4b9   :  { %v441_v38 = vpop.xlane.xlu0 %440 }
 0x4ba   :  { %1788 = vrcp.f32 %v441_v38 }
 0x4c0   :  { %v1789_v41 = vpop.eup %1788 }
 0x4c1   :  { %v469_v43 = vmul.f32 %v1789_v41, %v2289_v40 }
 0x4c5   :  { %v1695_v32 = vpop.permute.xlu1 %1694  ;;  %v447_v44 = vpop.xlane.xlu2 %446 }
 0x4c6   :  { %v1696_v33 = vunpack.i.l.bf16 %v1695_v32  ;;  %v1697_v37 = vunpack.i.h.bf16 %v1695_v32 }
 0x4c8   :  { %536 = vmatpush.msrb.mxu2 %v1696_v33  ;;  %v1748_v33 = vld [vmem:[%s2781_s4 + $0x3] ss:$0 sm:$0xff] }
 0x4ca   :  { %537 = vmatpush.msrb.mxu2 %v1697_v37 }
 0x4cc   :  { %538 = vmatpush.msrb.mxu2 %v1701_v49 }
 0x4cd   :  { %v450_v58 = vpop.xlane.xlu2 %449 }
 0x4ce   :  { %539 = vmatpush.msrb.mxu2 %v1702_v48 }
 0x4cf   :  { %1592 = vmatmul.msk.f32.vlgmr.msrb.gmra.mxu2 %vm2787_vm0, %v468_v17 }
 0x4d7   :  { %1593 = vmatmul.msk.f32.gmra.mxu2 %vm2787_vm0, %v469_v43 }
 0x4f0   :  { %v444_v27 = vpop.xlane.xlu1 %443 }
 0x4f1   :  { %1790 = vrcp.f32 %v444_v27  ;;  %v703_v27 = vld [vmem:[%s2779_s2 + $0x38] sm:$0xff] }
 0x4f2   :  { %1792 = vrcp.f32 %v447_v44  ;;  %724 = vmatpush.msra.mxu2 %v703_v27  ;;  %v701_v44 = vld [vmem:[%s2779_s2 + $0x18] sm:$0xff]  ;;  %v798_v27 = vld [vmem:[%s2780_s3 + $0x28] sm:$0xff] }
 0x4f3   :  { %1794 = vrcp.f32 %v450_v58 }
 0x4f7   :  { %v1791_v45 = vpop.eup %1790 }
 0x4f8   :  { %v470_v56 = vmul.f32 %v1791_v45, %v1781_v1  ;;  %v1793_v62 = vpop.eup %1792 }
 0x4f9   :  { %v471_v35 = vmul.f32 %v1793_v62, %v2293_v57  ;;  %v1795_v2 = vpop.eup %1794  ;;  %v456_v57 = vpop.xlane.xlu2 %455 }
 0x4fa   :  { %1594 = vmatmul.msk.f32.gmra.mxu2 %vm2787_vm0, %v470_v56  ;;  %v472_v40 = vmul.f32 %v1795_v2, %v2300_v12 }
 0x4fb   :  { %v453_v63 = vpop.xlane.xlu0 %452 }
 0x4fc   :  { %1796 = vrcp.f32 %v453_v63 }
 0x4fd   :  { %1798 = vrcp.f32 %v456_v57 }
 0x502   :  { %1595 = vmatmul.msk.f32.gmra.mxu2 %vm2787_vm0, %v471_v35  ;;  %v1797_v60 = vpop.eup %1796 }
 0x503   :  { %v473_v3 = vmul.f32 %v1797_v60, %v1783_v21  ;;  %v1799_v13 = vpop.eup %1798  ;;  %v700_v60 = vld [vmem:[%s2779_s2 + $0x8] sm:$0xff] }
 0x504   :  { %v474_v6 = vmul.f32 %v1799_v13, %v2304_v15 }
 0x506   :  { %v459_v4 = vpop.xlane.xlu0 %458 }
 0x507   :  { %1800 = vrcp.f32 %v459_v4 }
 0x508   :  { %v1705_v16 = vpop.permute.xlu1 %1704 }
 0x509   :  { %v1706_v18 = vunpack.i.l.bf16 %v1705_v16  ;;  %v1707_v36 = vunpack.i.h.bf16 %v1705_v16  ;;  %v1749_v16 = vld [vmem:[%s2781_s4 + $0x4] ss:$0 sm:$0xff] }
 0x50a   :  { %1596 = vmatmul.msk.f32.gmra.mxu2 %vm2787_vm0, %v472_v40 }
 0x50b   :  { %631 = vmatpush.msra.mxu1 %v1706_v18 }
 0x50d   :  { %v1801_v7 = vpop.eup %1800  ;;  %632 = vmatpush.msra.mxu1 %v1707_v36 }
 0x50e   :  { %v475_v8 = vmul.f32 %v1801_v7, %v1785_v39 }
 0x512   :  { %1597 = vmatmul.msk.f32.gmra.mxu2 %vm2787_vm0, %v473_v3 }
 0x519   :  { %v1710_v1 = vpop.permute.xlu0 %1709 }
 0x51a   :  { %1598 = vmatmul.msk.f32.gmra.mxu2 %vm2787_vm0, %v474_v6  ;;  %v1711_v54 = vunpack.i.l.bf16 %v1710_v1  ;;  %v1712_v19 = vunpack.i.h.bf16 %v1710_v1 }
 0x51c   :  { %633 = vmatpush.msra.mxu1 %v1711_v54  ;;  %v1750_v54 = vld [vmem:[%s2781_s4 + $0x5] ss:$0 sm:$0xff] }
 0x51e   :  { %634 = vmatpush.msra.mxu1 %v1712_v19 }
 0x522   :  { %1599 = vmatmul.msk.f32.gmra.mxu2 %vm2787_vm0, %v475_v8 }
 0x552   :  { %v541_v9 = vpop.f32.mrf.mxu2 }
 0x55a   :  { %v544_v10 = vpop.f32.mrf.mxu2 }
 0x57d   :  { %v547_v11 = vpop.f32.mrf.mxu2 }
 0x57e   :  { %567 = vrot.lane.b32.xlu2 %v547_v11, %s1897_s26 }
 0x585   :  { %v550_v12 = vpop.f32.mrf.mxu2 }
 0x586   :  { %569 = vrot.lane.b32.xlu2 %v550_v12, %s1897_s26 }
 0x58d   :  { %v553_v14 = vpop.f32.mrf.mxu2 }
 0x58e   :  { %575 = vrot.lane.b32.xlu1 %v553_v14, %s1898_s27 }
 0x595   :  { %v556_v52 = vpop.f32.mrf.mxu2 }
 0x596   :  { %577 = vrot.lane.b32.xlu1 %v556_v52, %s1898_s27 }
 0x59d   :  { %v559_v55 = vpop.f32.mrf.mxu2 }
 0x59e   :  { %583 = vrot.lane.b32.xlu0 %v559_v55, %s1899_s0 }
 0x5a5   :  { %v562_v15 = vpop.f32.mrf.mxu2 }
 0x5a6   :  { %585 = vrot.lane.b32.xlu0 %v562_v15, %s1899_s0 }
 0x5d8   :  { %v568_v20 = vpop.permute.xlu2 %567 }
 0x5d9   :  { %v589_v21 = vsel %vm2785_vm13, %v541_v9, %v568_v20 }
 0x5e0   :  { %v570_v25 = vpop.permute.xlu2 %569 }
 0x5e1   :  { %v590_v26 = vsel %vm2785_vm13, %v544_v10, %v570_v25 }
 0x600   :  { %v576_v53 = vpop.permute.xlu1 %575 }
 0x601   :  { %v592_v23 = vsel %vm2784_vm15, %v589_v21, %v576_v53 }
 0x608   :  { %v578_v39 = vpop.permute.xlu1 %577 }
 0x609   :  { %v593_v31 = vsel %vm2784_vm15, %v590_v26, %v578_v39  ;;  %v1751_v26 = vld [vmem:[%s2781_s4 + $0x6] ss:$0 sm:$0xff] }
 0x610   :  { %v584_v50 = vpop.permute.xlu0 %583 }
 0x611   :  { %v595_v24 = vsel %vm2783_vm9, %v592_v23, %v584_v50 }
 0x612   :  { %1600 = vmatmul.msk.f32.vlgmr.msra.gmra.mxu1 %vm2786_vm3, %v595_v24 }
 0x618   :  { %v586_v5 = vpop.permute.xlu0 %585 }
 0x619   :  { %v596_v32 = vsel %vm2783_vm9, %v593_v31, %v586_v5 }
 0x61a   :  { %1601 = vmatmul.msk.f32.gmra.mxu1 %vm2786_vm3, %v596_v32 }
 0x68f   :  { %v636_v37 = vpop.f32.mrf.mxu1 }
 0x690   :  { %v642_v38 = vadd.f32 %v636_v37, %v2035_v42  ;;  %v702_v42 = vld [vmem:[%s2779_s2 + $0x28] sm:$0xff]  ;;  %v800_v37 = vld [vmem:[%s2780_s3 + $0x38] sm:$0xff] }
 0x691   :  { %725 = vmatpush.msra.mxu2 %v702_v42  ;;  %815 = vmatpush.msrb.mxu1 %v800_v37 }
 0x692   :  { %v2353_v46 = vadd.f32 %v1748_v33, %v642_v38 }
 0x693   :  { %726 = vmatpush.msra.mxu2 %v701_v44  ;;  %v797_v44 = vld [vmem:[%s2780_s3 + $0x20] sm:$0xff] }
 0x694   :  { %v650_v49 = vsel %vm2786_vm3, %v2353_v46, 0.0 }
 0x695   :  { %651 = vadd.xlane.f32.xlu2 %v650_v49  ;;  %727 = vmatpush.msra.mxu2 %v700_v60  ;;  %v799_v49 = vld [vmem:[%s2780_s3 + $0x30] sm:$0xff] }
 0x696   :  { %816 = vmatpush.msrb.mxu1 %v799_v49 }
 0x697   :  { %v639_v48 = vpop.f32.mrf.mxu1 }
 0x698   :  { %v643_v17 = vadd.f32 %v639_v48, %v2042_v51  ;;  %817 = vmatpush.msrb.mxu1 %v798_v27 }
 0x69a   :  { %v2358_v41 = vadd.f32 %v1748_v33, %v643_v17  ;;  %818 = vmatpush.msrb.mxu1 %v797_v44 }
 0x69c   :  { %v653_v43 = vsel %vm2786_vm3, %v2358_v41, 0.0 }
 0x69d   :  { %654 = vadd.xlane.f32.xlu1 %v653_v43 }
 0x708   :  { %v652_v51 = vpop.xlane.xlu2 %651 }
 0x709   :  { %v656_v45 = vmul.f32 %v652_v51, %v2046_v59 }
 0x70b   :  { %v658_v56 = vsub.f32 %v2353_v46, %v656_v45  ;;  %v796_v45 = vld [vmem:[%s2780_s3 + $0x18] sm:$0xff] }
 0x70c   :  { %819 = vmatpush.msrb.mxu1 %v796_v45 }
 0x70d   :  { %v660_v58 = vmul.f32 %v658_v56, %v658_v56 }
 0x70f   :  { %v662_v62 = vsel %vm2786_vm3, %v660_v58, 0.0  ;;  %v795_v58 = vld [vmem:[%s2780_s3 + $0x10] sm:$0xff] }
 0x710   :  { %v655_v35 = vpop.xlane.xlu1 %654  ;;  %663 = vadd.xlane.f32.xlu0 %v662_v62  ;;  %820 = vmatpush.msrb.mxu1 %v795_v58 }
 0x711   :  { %v657_v63 = vmul.f32 %v655_v35, %v2046_v59 }
 0x713   :  { %v659_v2 = vsub.f32 %v2358_v41, %v657_v63  ;;  %v794_v63 = vld [vmem:[%s2780_s3 + $0x8] sm:$0xff] }
 0x714   :  { %821 = vmatpush.msrb.mxu1 %v794_v63 }
 0x715   :  { %v661_v40 = vmul.f32 %v659_v2, %v659_v2 }
 0x717   :  { %v665_v57 = vsel %vm2786_vm3, %v661_v40, 0.0  ;;  %v793_v40 = vld [vmem:[%s2780_s3] sm:$0xff] }
 0x718   :  { %666 = vadd.xlane.f32.xlu2 %v665_v57  ;;  %822 = vmatpush.msrb.mxu1 %v793_v40 }
 0x783   :  { %v664_v3 = vpop.xlane.xlu0 %663 }
 0x784   :  { %v668_v4 = vmul.f32 %v664_v3, %v2046_v59 }
 0x786   :  { %v670_v13 = vadd.f32 1e-06, %v668_v4 }
 0x788   :  { %1802 = vrsqrt.f32 %v670_v13  ;;  %vm678_vm14 = vweird.f32 %v670_v13 }
 0x78b   :  { %v667_v6 = vpop.xlane.xlu2 %666 }
 0x78c   :  { %v669_v7 = vmul.f32 %v667_v6, %v2046_v59 }
 0x78e   :  { %v1803_v8 = vpop.eup %1802  ;;  %v671_v9 = vadd.f32 1e-06, %v669_v7 }
 0x78f   :  { %v673_v10 = vmul.f32 %v1803_v8, %v670_v13  ;;  %vm679_vm11 = vweird.f32 %v1803_v8 }
 0x790   :  { %1804 = vrsqrt.f32 %v671_v9  ;;  %vm680_vm5 = vmor %vm678_vm14, %vm679_vm11  ;;  %vm688_vm15 = vweird.f32 %v671_v9 }
 0x791   :  { %v674_v11 = vmul.f32 %v1803_v8, %v673_v10 }
 0x793   :  { %v675_v12 = vmul.f32 0.5, %v674_v11 }
 0x795   :  { %v676_v14 = vsub.f32 1.5, %v675_v12 }
 0x796   :  { %v1805_v52 = vpop.eup %1804 }
 0x797   :  { %v677_v55 = vmul.f32 %v1803_v8, %v676_v14  ;;  %v683_v15 = vmul.f32 %v1805_v52, %v671_v9  ;;  %vm689_vm9 = vweird.f32 %v1805_v52 }
 0x798   :  { %vm690_vm13 = vmor %vm688_vm15, %vm689_vm9 }
 0x799   :  { %v681_v18 = vsel %vm680_vm5, %v1803_v8, %v677_v55  ;;  %v684_v36 = vmul.f32 %v1805_v52, %v683_v15 }
 0x79a   :  { %v692_v1 = vmul.f32 %v681_v18, %v658_v56 }
 0x79b   :  { %v685_v19 = vmul.f32 0.5, %v684_v36 }
 0x79c   :  { %v695_v20 = vmul.f32 %v1749_v16, %v692_v1 }
 0x79d   :  { %v686_v53 = vsub.f32 1.5, %v685_v19 }
 0x79e   :  { %v698_v21 = vadd.f32 %v1750_v54, %v695_v20 }
 0x79f   :  { %v687_v23 = vmul.f32 %v1805_v52, %v686_v53 }
 0x7a0   :  { %1602 = vmatmul.msk.f32.vlgmr.msra.gmra.mxu2 %vm2786_vm3, %v698_v21 }
 0x7a1   :  { %v691_v50 = vsel %vm690_vm13, %v1805_v52, %v687_v23 }
 0x7a2   :  { %v693_v24 = vmul.f32 %v691_v50, %v659_v2 }
 0x7a4   :  { %v696_v25 = vmul.f32 %v1749_v16, %v693_v24 }
 0x7a6   :  { %v699_v39 = vadd.f32 %v1750_v54, %v696_v25 }
 0x7a8   :  { %1603 = vmatmul.msk.f32.gmra.mxu2 %vm2786_vm3, %v699_v39 }
 0x823   :  { %v729_v31 = vpop.f32.mrf.mxu2 }
 0x824   :  { %v2393_v5 = vadd.f32 %v1751_v26, %v729_v31  ;;  %v1900_v31 = vmov -1.0  }
 0x826   :  { %v2396_v32 = vmul.f32 0.70710677, %v2393_v5  ;;  %v735_v49 = vmul.f32 0.5, %v2393_v5  ;;  %v1752_v5 = vld [vmem:[%s2781_s4 + $0x7] ss:$0 sm:$0xff] }
 0x828   :  { %v743_v33 = vand.u32 2147483647, %v2396_v32  ;;  %vm739_vm13 = vcmp.ge.f32.partialorder %v2396_v32, 0.0 }
 0x82a   :  { %v745_v38 = vmul.f32 0.3275911, %v743_v33  ;;  %v775_v3 = vsub.f32 0.0, %v743_v33 }
 0x82b   :  { %v732_v48 = vpop.f32.mrf.mxu2 }
 0x82c   :  { %v747_v17 = vadd.f32 1.0, %v745_v38  ;;  %v2405_v43 = vadd.f32 %v1751_v26, %v732_v48  ;;  %v777_v8 = vmul.f32 %v775_v3, %v743_v33  ;;  %v741_v33 = vsel %vm739_vm13, 1.0, %v1900_v31 }
 0x82e   :  { %1806 = vrcp.f32 %v747_v17  ;;  %v2411_v42 = vmul.f32 0.70710677, %v2405_v43  ;;  %v779_v14 = vmul.f32 1.442695, %v777_v8  ;;  %v736_v58 = vmul.f32 0.5, %v2405_v43 }
 0x830   :  { %v744_v51 = vand.u32 2147483647, %v2411_v42  ;;  %vm740_vm15 = vcmp.ge.f32.partialorder %v2411_v42, 0.0 }
 0x831   :  { %v742_v45 = vsel %vm740_vm15, 1.0, %v1900_v31 }
 0x832   :  { %v746_v56 = vmul.f32 0.3275911, %v744_v51  ;;  %v776_v52 = vsub.f32 0.0, %v744_v51 }
 0x834   :  { %v1807_v62 = vpop.eup %1806  ;;  %v748_v35 = vadd.f32 1.0, %v746_v56  ;;  %v778_v36 = vmul.f32 %v776_v52, %v744_v51  ;;  %v2471_v52 = vld [vmem:[%s2779_s2 + $0x50] sm:$0xff] }
 0x835   :  { %v751_v2 = vmul.f32 %v1807_v62, %v747_v17 }
 0x836   :  { %1808 = vrcp.f32 %v748_v35  ;;  %v781_v53 = vmul.f32 1.442695, %v778_v36 }
 0x837   :  { %v753_v57 = vsub.f32 2.0, %v751_v2  ;;  %1810 = vpow2.f32 %v779_v14  ;;  %v2465_v14 = vld [vmem:[%s2779_s2 + $0x60] sm:$0xff] }
 0x838   :  { %1812 = vpow2.f32 %v781_v53 }
 0x839   :  { %v755_v60 = vmul.f32 %v1807_v62, %v753_v57 }
 0x83b   :  { %v757_v4 = vmul.f32 1.0614054, %v755_v60 }
 0x83c   :  { %v1809_v13 = vpop.eup %1808 }
 0x83d   :  { %v759_v6 = vadd.f32 -1.4531521, %v757_v4  ;;  %v752_v7 = vmul.f32 %v1809_v13, %v748_v35  ;;  %v1811_v50 = vpop.eup %1810 }
 0x83e   :  { %v1813_v27 = vpop.eup %1812 }
 0x83f   :  { %v761_v9 = vmul.f32 %v759_v6, %v755_v60  ;;  %v754_v10 = vsub.f32 2.0, %v752_v7 }
 0x841   :  { %v763_v11 = vadd.f32 1.4214138, %v761_v9  ;;  %v756_v12 = vmul.f32 %v1809_v13, %v754_v10 }
 0x843   :  { %v765_v55 = vmul.f32 %v763_v11, %v755_v60  ;;  %v758_v15 = vmul.f32 1.0614054, %v756_v12 }
 0x845   :  { %v767_v16 = vadd.f32 -0.28449672, %v765_v55  ;;  %v760_v18 = vadd.f32 -1.4531521, %v758_v15  ;;  %v2477_v55 = vld [vmem:[%s2779_s2 + $0x40] sm:$0xff] }
 0x847   :  { %v769_v1 = vmul.f32 %v767_v16, %v755_v60  ;;  %v762_v54 = vmul.f32 %v760_v18, %v756_v12  ;;  %v1738_v16 = vpack.i.bf16 %v2477_v55, %v2471_v52 }
 0x849   :  { %v771_v19 = vadd.f32 0.2548296, %v769_v1  ;;  %v764_v20 = vadd.f32 1.4214138, %v762_v54 }
 0x84b   :  { %v773_v21 = vmul.f32 %v771_v19, %v755_v60  ;;  %v766_v23 = vmul.f32 %v764_v20, %v756_v12 }
 0x84d   :  { %v783_v24 = vmul.f32 %v1811_v50, %v773_v21  ;;  %v768_v25 = vadd.f32 -0.28449672, %v766_v23 }
 0x84f   :  { %v785_v39 = vsub.f32 1.0, %v783_v24  ;;  %v770_v26 = vmul.f32 %v768_v25, %v756_v12 }
 0x851   :  { %v787_v37 = vmul.f32 %v785_v39, %v741_v33  ;;  %v772_v38 = vadd.f32 0.2548296, %v770_v26  ;;  %v1753_v33 = vld [vmem:[%s2781_s4 + $0x8] ss:$0 sm:$0xff] }
 0x853   :  { %v789_v48 = vadd.f32 1.0, %v787_v37  ;;  %v774_v17 = vmul.f32 %v772_v38, %v756_v12  ;;  %v2459_v12 = vld [vmem:[%s2779_s2 + $0x70] sm:$0xff] }
 0x854   :  { %914 = vmatpush.msrb.mxu0 %v2459_v12  ;;  %v1733_v15 = vpack.i.bf16 %v2465_v14, %v2459_v12 }
 0x855   :  { %v791_v44 = vmul.f32 %v789_v48, %v735_v49  ;;  %v784_v51 = vmul.f32 %v1813_v27, %v774_v17  ;;  %v1754_v48 = vld [vmem:[%s2781_s4 + $0x9] ss:$0 sm:$0xff] }
 0x856   :  { %915 = vmatpush.msrb.mxu0 %v2465_v14 }
 0x857   :  { %1604 = vmatmul.msk.f32.vlgmr.msrb.gmra.mxu1 %vm2787_vm0, %v791_v44  ;;  %v786_v32 = vsub.f32 1.0, %v784_v51 }
 0x858   :  { %916 = vmatpush.msrb.mxu0 %v2471_v52 }
 0x859   :  { %v788_v56 = vmul.f32 %v786_v32, %v742_v45 }
 0x85a   :  { %917 = vmatpush.msrb.mxu0 %v2477_v55 }
 0x85b   :  { %v790_v62 = vadd.f32 1.0, %v788_v56 }
 0x85d   :  { %v792_v35 = vmul.f32 %v790_v62, %v736_v58 }
 0x85f   :  { %1605 = vmatmul.msk.f32.gmra.mxu1 %vm2787_vm0, %v792_v35  ;;  %v1755_v35 = vld [vmem:[%s2781_s4 + $0xa] ss:$0 sm:$0xff] }
 0x8d4   :  { %v824_v63 = vpop.f32.mrf.mxu1 }
 0x8d5   :  { %v830_v42 = vadd.f32 %v824_v63, %v2353_v46 }
 0x8d7   :  { %v2441_v2 = vadd.f32 %v1752_v5, %v830_v42 }
 0x8d9   :  { %v839_v40 = vsel %vm2786_vm3, %v2441_v2, 0.0 }
 0x8da   :  { %840 = vadd.xlane.f32.xlu1 %v839_v40 }
 0x8dc   :  { %v827_v57 = vpop.f32.mrf.mxu1 }
 0x8dd   :  { %v831_v43 = vadd.f32 %v827_v57, %v2358_v41 }
 0x8df   :  { %v2446_v60 = vadd.f32 %v1752_v5, %v831_v43 }
 0x8e1   :  { %v842_v3 = vsel %vm2786_vm3, %v2446_v60, 0.0 }
 0x8e2   :  { %843 = vadd.xlane.f32.xlu0 %v842_v3 }
 0x94d   :  { %v841_v4 = vpop.xlane.xlu1 %840 }
 0x94e   :  { %v845_v13 = vmul.f32 %v841_v4, %v2046_v59 }
 0x950   :  { %v847_v46 = vsub.f32 %v2441_v2, %v845_v13 }
 0x952   :  { %v849_v6 = vmul.f32 %v847_v46, %v847_v46 }
 0x954   :  { %v851_v7 = vsel %vm2786_vm3, %v849_v6, 0.0 }
 0x955   :  { %852 = vadd.xlane.f32.xlu2 %v851_v7  ;;  %v844_v8 = vpop.xlane.xlu0 %843 }
 0x956   :  { %v846_v9 = vmul.f32 %v844_v8, %v2046_v59 }
 0x958   :  { %v848_v41 = vsub.f32 %v2446_v60, %v846_v9 }
 0x95a   :  { %v850_v10 = vmul.f32 %v848_v41, %v848_v41 }
 0x95c   :  { %v854_v11 = vsel %vm2786_vm3, %v850_v10, 0.0 }
 0x95d   :  { %855 = vadd.xlane.f32.xlu1 %v854_v11 }
 0x9c8   :  { %v853_v18 = vpop.xlane.xlu2 %852 }
 0x9c9   :  { %v857_v36 = vmul.f32 %v853_v18, %v2046_v59 }
 0x9cb   :  { %v859_v1 = vadd.f32 1e-06, %v857_v36 }
 0x9cd   :  { %1814 = vrsqrt.f32 %v859_v1  ;;  %vm867_vm11 = vweird.f32 %v859_v1 }
 0x9d0   :  { %v856_v54 = vpop.xlane.xlu1 %855 }
 0x9d1   :  { %v858_v19 = vmul.f32 %v856_v54, %v2046_v59 }
 0x9d3   :  { %v1815_v20 = vpop.eup %1814  ;;  %v860_v53 = vadd.f32 1e-06, %v858_v19 }
 0x9d4   :  { %v862_v21 = vmul.f32 %v1815_v20, %v859_v1  ;;  %vm868_vm9 = vweird.f32 %v1815_v20 }
 0x9d5   :  { %1816 = vrsqrt.f32 %v860_v53  ;;  %vm869_vm14 = vmor %vm867_vm11, %vm868_vm9  ;;  %vm877_vm13 = vweird.f32 %v860_v53  ;;  %vm2806_vm9 = vcmask 64512  }
 0x9d6   :  { %v863_v23 = vmul.f32 %v1815_v20, %v862_v21  ;;  %vm2807_vm11 = vmmov %vm2806_vm9 }
 0x9d8   :  { %v864_v50 = vmul.f32 0.5, %v863_v23 }
 0x9da   :  { %v865_v24 = vsub.f32 1.5, %v864_v50 }
 0x9db   :  { %v1817_v25 = vpop.eup %1816 }
 0x9dc   :  { %v866_v39 = vmul.f32 %v1815_v20, %v865_v24  ;;  %v872_v26 = vmul.f32 %v1817_v25, %v860_v53  ;;  %vm878_vm5 = vweird.f32 %v1817_v25 }
 0x9dd   :  { %vm879_vm15 = vmor %vm877_vm13, %vm878_vm5 }
 0x9de   :  { %v870_v37 = vsel %vm869_vm14, %v1815_v20, %v866_v39  ;;  %v873_v38 = vmul.f32 %v1817_v25, %v872_v26  ;;  %vm2808_vm14 = vmmov %vm2806_vm9 }
 0x9df   :  { %v881_v49 = vmul.f32 %v870_v37, %v847_v46  ;;  %vm2809_vm5 = vmmov %vm2806_vm9 }
 0x9e0   :  { %v874_v17 = vmul.f32 0.5, %v873_v38  ;;  %vm2810_vm13 = vmmov %vm2809_vm5 }
 0x9e1   :  { %v884_v27 = vmul.f32 %v1753_v33, %v881_v49 }
 0x9e2   :  { %v875_v44 = vsub.f32 1.5, %v874_v17 }
 0x9e3   :  { %v887_v51 = vadd.f32 %v1754_v48, %v884_v27 }
 0x9e4   :  { %v876_v32 = vmul.f32 %v1817_v25, %v875_v44 }
 0x9e5   :  { %1613 = vmatmul.msk.f32.vlgmr.msrb.gmra.mxu0 %vm2786_vm3, %v887_v51 }
 0x9e6   :  { %v880_v45 = vsel %vm879_vm15, %v1817_v25, %v876_v32  ;;  %vm2811_vm15 = vmmov %vm2809_vm5 }
 0x9e7   :  { %v882_v56 = vmul.f32 %v880_v45, %v848_v41 }
 0x9e9   :  { %v885_v58 = vmul.f32 %v1753_v33, %v882_v56 }
 0x9eb   :  { %v888_v62 = vadd.f32 %v1754_v48, %v885_v58 }
 0x9ed   :  { %1614 = vmatmul.msk.f32.gmra.mxu0 %vm2786_vm3, %v888_v62  ;;  %vm2812_vm3 = vmmov %vm2809_vm5 }
 0x9ee   :  { %vm2819_vm0 = vmmov %vm2812_vm3 }
 0xa62   :  { %v919_v5 = vpop.f32.mrf.mxu0 }
 0xa63   :  { %v2497_v63 = vadd.f32 %v1755_v35, %v919_v5 }
 0xa65   :  { %935 = vrot.lane.b32.xlu2 %v2497_v63, %s1892_s21 }
 0xa6a   :  { %v922_v42 = vpop.f32.mrf.mxu0 }
 0xa6b   :  { %v2501_v40 = vadd.f32 %v1755_v35, %v922_v42 }
 0xa6d   :  { %933 = vrot.lane.b32.xlu1 %v2501_v40, %s1891_s20  ;;  %937 = vrot.lane.b32.xlu0 %v2501_v40, %s1892_s21  ;;  %v1728_v5 = vpack.i.bf16 %v2497_v63, %v2501_v40 }
 0xa6e   :  { %929 = vrot.lane.b32.xlu2 %v2501_v40, %s1893_s22 }
 0xa75   :  { %931 = vrot.lane.b32.xlu0 %v2497_v63, %s1891_s20 }
 0xa7d   :  { %927 = vrot.lane.b32.xlu0 %v2497_v63, %s1893_s22 }
 0xabf   :  { %v936_v57 = vpop.permute.xlu2 %935 }
 0xac0   :  { %951 = vrot.lane.b32.xlu2 %v936_v57, %s1894_s23 }
 0xac8   :  { %v2514_v43 = vpop.permute.xlu2 %929 }
 0xac9   :  { %945 = vrot.lane.b32.xlu2 %v2514_v43, %s1894_s23 }
 0xad1   :  { %939 = vrot.lane.b32.xlu2 %v2497_v63, %s1894_s23 }
 0xadf   :  { %v2520_v3 = vpop.permute.xlu1 %933  ;;  %v938_v4 = vpop.permute.xlu0 %937 }
 0xae0   :  { %953 = vrot.lane.b32.xlu1 %v938_v4, %s1894_s23  ;;  %949 = vrot.lane.b32.xlu0 %v2520_v3, %s1894_s23  ;;  %v1713_v28 = vpack.i.bf16 %v936_v57, %v938_v4 }
 0xae7   :  { %v2525_v13 = vpop.permute.xlu0 %931 }
 0xae8   :  { %947 = vrot.lane.b32.xlu1 %v2525_v13, %s1894_s23  ;;  %v1718_v35 = vpack.i.bf16 %v2525_v13, %v2520_v3 }
 0xaef   :  { %v2529_v46 = vpop.permute.xlu0 %927 }
 0xaf0   :  { %941 = vrot.lane.b32.xlu1 %v2501_v40, %s1894_s23  ;;  %943 = vrot.lane.b32.xlu0 %v2529_v46, %s1894_s23  ;;  %v1723_v61 = vpack.i.bf16 %v2529_v46, %v2514_v43 }
 0xb1a   :  { %v952_v7 = vpop.permute.xlu2 %951 }
 0xb23   :  { %v946_v41 = vpop.permute.xlu2 %945 }
 0xb2b   :  { %v940_v18 = vpop.permute.xlu2 %939 }
 0xb52   :  { %v954_v6 = vpop.permute.xlu1 %953  ;;  %v950_v8 = vpop.permute.xlu0 %949 }
 0xb53   :  { %1615 = vmatpush.xpose.msk.msra.mxu1 %vm2806_vm9, %v954_v6  ;;  %vm2813_vm9 = vmmov %vm2812_vm3 }
 0xb57   :  { %1616 = vmatpush.xpose.msk.msra.mxu1 %vm2807_vm11, %v952_v7  ;;  %vm2814_vm11 = vmmov %vm2812_vm3 }
 0xb5a   :  { %v948_v9 = vpop.permute.xlu1 %947 }
 0xb5b   :  { %1617 = vmatpush.xpose.msk.msra.mxu1 %vm2808_vm14, %v950_v8  ;;  %vm2815_vm14 = vmmov %vm2812_vm3 }
 0xb5f   :  { %1618 = vmatpush.xpose.msk.msra.mxu1 %vm2809_vm5, %v948_v9  ;;  %vm2816_vm5 = vmmov %vm2812_vm3 }
 0xb62   :  { %v944_v10 = vpop.permute.xlu0 %943  ;;  %v942_v11 = vpop.permute.xlu1 %941 }
 0xb63   :  { %1619 = vmatpush.xpose.msk.msra.mxu1 %vm2810_vm13, %v946_v41  ;;  %vm2817_vm13 = vmmov %vm2812_vm3 }
 0xb67   :  { %1620 = vmatpush.xpose.msk.msra.mxu1 %vm2811_vm15, %v944_v10  ;;  %vm2818_vm15 = vmmov %vm2812_vm3 }
 0xb6b   :  { %1621 = vmatpush.xpose.msk.msra.mxu1 %vm2812_vm3, %v942_v11 }
 0xb6f   :  { %1622 = vmatpush.xpose.msk.msra.mxu1 %vm2813_vm9, %v940_v18  ;;  %vm2820_vm9 = vmmov %vm2819_vm0 }
 0xb72   :  { %1623 = vmatmul.msk.f32.vlgmr.msra.gmra.mxu1 %vm2814_vm11, %v2497_v63  ;;  %vm2821_vm11 = vcmask 523264  }
 0xb7a   :  { %1624 = vmatmul.msk.f32.gmra.mxu1 %vm2815_vm14, %v2501_v40  ;;  %vm2822_vm14 = vmmov %vm2821_vm11 }
 0xb82   :  { %1625 = vmatmul.msk.f32.gmra.mxu1 %vm2816_vm5, %v2529_v46 }
 0xb8a   :  { %1626 = vmatmul.msk.f32.gmra.mxu1 %vm2817_vm13, %v2514_v43 }
 0xb92   :  { %1627 = vmatmul.msk.f32.gmra.mxu1 %vm2818_vm15, %v2525_v13 }
 0xb9a   :  { %1628 = vmatmul.msk.f32.gmra.mxu1 %vm2812_vm3, %v2520_v3 }
 0xba2   :  { %1629 = vmatmul.msk.f32.gmra.mxu1 %vm2819_vm0, %v936_v57  ;;  %vm2823_vm0 = vmmov %vm2821_vm11 }
 0xba3   :  { %vm2832_vm5 = vmmov %vm2823_vm0 }
 0xba4   :  { %vm2833_vm13 = vmmov %vm2823_vm0 }
 0xba5   :  { %vm2834_vm15 = vmmov %vm2823_vm0 }
 0xba6   :  { %vm2835_vm3 = vmmov %vm2823_vm0 }
 0xbaa   :  { %1630 = vmatmul.msk.f32.gmra.mxu1 %vm2820_vm9, %v938_v4  ;;  %vm2836_vm9 = vmmov %vm2823_vm0 }
 0xbef   :  { %v1004_v36 = vpop.f32.mrf.mxu1 }
 0xbf0   :  { %v1028_v1 = vmul.f32 0.35355338, %v1004_v36 }
 0xbf2   :  { %v1036_v54 = vsel %vm2177_vm1, %v1028_v1, -1e+30  ;;  %vm2824_vm1 = vmmov %vm2823_vm0 }
 0xbf3   :  { %v1044_v19 = vsel %vm2821_vm11, %v1036_v54, -inf  ;;  %vm2837_vm11 = vmmov %vm2823_vm0 }
 0xbf4   :  { %1045 = vmax.xlane.f32.xlu0 %v1044_v19 }
 0xbf7   :  { %v1007_v20 = vpop.f32.mrf.mxu1 }
 0xbf8   :  { %v1029_v53 = vmul.f32 0.35355338, %v1007_v20 }
 0xbfa   :  { %v1037_v21 = vsel %vm2193_vm4, %v1029_v53, -1e+30  ;;  %vm2825_vm4 = vmmov %vm2823_vm0 }
 0xbfb   :  { %v1047_v23 = vsel %vm2822_vm14, %v1037_v21, -inf  ;;  %vm2838_vm14 = vmmov %vm2823_vm0 }
 0xbfc   :  { %1048 = vmax.xlane.f32.xlu1 %v1047_v23 }
 0xbff   :  { %v1010_v50 = vpop.f32.mrf.mxu1 }
 0xc00   :  { %v1030_v24 = vmul.f32 0.35355338, %v1010_v50 }
 0xc02   :  { %v1038_v25 = vsel %vm2213_vm8, %v1030_v24, -1e+30  ;;  %vm2826_vm8 = vmmov %vm2823_vm0 }
 0xc03   :  { %v1050_v39 = vsel %vm2823_vm0, %v1038_v25, -inf }
 0xc04   :  { %1051 = vmax.xlane.f32.xlu2 %v1050_v39 }
 0xc07   :  { %v1013_v26 = vpop.f32.mrf.mxu1 }
 0xc08   :  { %1714 = vrot.lane.b32.xlu0 %v1713_v28, %s1895_s24  ;;  %v1031_v56 = vmul.f32 0.35355338, %v1013_v26 }
 0xc0a   :  { %v2584_v62 = vsel %vm2229_vm10, %v1031_v56, -1e+30  ;;  %vm2829_vm10 = vmmov %vm2823_vm0 }
 0xc0f   :  { %v1016_v33 = vpop.f32.mrf.mxu1 }
 0xc10   :  { %v1032_v37 = vmul.f32 0.35355338, %v1016_v33 }
 0xc12   :  { %v1040_v22 = vsel %vm2244_vm2, %v1032_v37, -1e+30  ;;  %vm2828_vm2 = vmmov %vm2823_vm0 }
 0xc13   :  { %v1056_v38 = vsel %vm2824_vm1, %v1040_v22, -inf  ;;  %v1053_v29 = vsel %vm2828_vm2, %v2584_v62, -inf  ;;  %vm2839_vm1 = vmmov %vm2823_vm0 }
 0xc14   :  { %1057 = vmax.xlane.f32.xlu1 %v1056_v38  ;;  %vm2843_vm2 = vmmov %vm2823_vm0 }
 0xc17   :  { %v1019_v49 = vpop.f32.mrf.mxu1 }
 0xc18   :  { %v1033_v48 = vmul.f32 0.35355338, %v1019_v49 }
 0xc1a   :  { %v1041_v34 = vsel %vm2204_vm6, %v1033_v48, -1e+30  ;;  %vm2827_vm6 = vmmov %vm2823_vm0 }
 0xc1b   :  { %v1059_v17 = vsel %vm2825_vm4, %v1041_v34, -inf  ;;  %vm2840_vm4 = vmmov %vm2823_vm0 }
 0xc1c   :  { %1060 = vmax.xlane.f32.xlu2 %v1059_v17 }
 0xc1f   :  { %v1022_v27 = vpop.f32.mrf.mxu1 }
 0xc20   :  { %v1034_v44 = vmul.f32 0.35355338, %v1022_v27 }
 0xc22   :  { %v1042_v51 = vsel %vm2258_vm7, %v1034_v44, -1e+30  ;;  %vm2831_vm7 = vmmov %vm2823_vm0 }
 0xc23   :  { %v1062_v32 = vsel %vm2826_vm8, %v1042_v51, -inf  ;;  %vm2841_vm8 = vmmov %vm2823_vm0 }
 0xc24   :  { %1063 = vmax.xlane.f32.xlu1 %v1062_v32 }
 0xc27   :  { %v1025_v0 = vpop.f32.mrf.mxu1 }
 0xc28   :  { %v1035_v45 = vmul.f32 0.35355338, %v1025_v0 }
 0xc2a   :  { %v2578_v58 = vsel %vm2237_vm12, %v1035_v45, -1e+30  ;;  %vm2830_vm12 = vmmov %vm2823_vm0 }
 0xc2b   :  { %v1065_v30 = vsel %vm2827_vm6, %v2578_v58, -inf  ;;  %vm2842_vm6 = vmmov %vm2823_vm0 }
 0xc2c   :  { %1066 = vmax.xlane.f32.xlu1 %v1065_v30 }
 0xc32   :  { %1054 = vmax.xlane.f32.xlu0 %v1053_v29 }
 0xc34   :  { %1719 = vrot.lane.b32.xlu2 %v1718_v35, %s1895_s24 }
 0xc46   :  { %1724 = vrot.lane.b32.xlu0 %v1723_v61, %s1895_s24 }
 0xc4e   :  { %1729 = vrot.lane.b32.xlu0 %v1728_v5, %s1895_s24 }
 0xc67   :  { %v1046_v47 = vpop.xlane.xlu0 %1045 }
 0xc68   :  { %v1068_v42 = vsub.f32 %v1036_v54, %v1046_v47 }
 0xc6a   :  { %v1076_v57 = vmul.f32 1.442695, %v1068_v42 }
 0xc6c   :  { %1818 = vpow2.f32 %v1076_v57 }
 0xc6f   :  { %v1049_v4 = vpop.xlane.xlu1 %1048 }
 0xc70   :  { %v1069_v6 = vsub.f32 %v1037_v21, %v1049_v4 }
 0xc72   :  { %v2597_v3 = vpop.eup %1818  ;;  %v1078_v13 = vmul.f32 1.442695, %v1069_v6 }
 0xc73   :  { %v1092_v7 = vsel %vm2829_vm10, %v2597_v3, 0.0  ;;  %vm2844_vm10 = vcmask 64512  }
 0xc74   :  { %1820 = vpow2.f32 %v1078_v13  ;;  %1093 = vadd.xlane.f32.xlu1 %v1092_v7 }
 0xc77   :  { %v1052_v43 = vpop.xlane.xlu2 %1051 }
 0xc78   :  { %v1070_v46 = vsub.f32 %v1038_v25, %v1052_v43 }
 0xc7a   :  { %v2601_v8 = vpop.eup %1820  ;;  %v1080_v63 = vmul.f32 1.442695, %v1070_v46  ;;  %v1715_v40 = vpop.permute.xlu0 %1714 }
 0xc7b   :  { %v1716_v9 = vunpack.i.l.bf16 %v1715_v40  ;;  %v1095_v41 = vsel %vm2830_vm12, %v2601_v8, 0.0  ;;  %v1717_v10 = vunpack.i.h.bf16 %v1715_v40  ;;  %vm2845_vm12 = vcmask 130048  }
 0xc7c   :  { %1822 = vpow2.f32 %v1080_v63  ;;  %1096 = vadd.xlane.f32.xlu1 %v1095_v41 }
 0xc7d   :  { %1188 = vmatpush.msra.mxu0 %v1716_v9 }
 0xc7f   :  { %1189 = vmatpush.msra.mxu0 %v1717_v10 }
 0xc82   :  { %v2605_v11 = vpop.eup %1822 }
 0xc83   :  { %v1098_v18 = vsel %vm2831_vm7, %v2605_v11, 0.0  ;;  %vm2846_vm7 = vcmask 195584  }
 0xc84   :  { %1099 = vadd.xlane.f32.xlu2 %v1098_v18 }
 0xc87   :  { %v1058_v36 = vpop.xlane.xlu1 %1057 }
 0xc88   :  { %v1072_v1 = vsub.f32 %v1040_v22, %v1058_v36 }
 0xc8a   :  { %v1084_v54 = vmul.f32 1.442695, %v1072_v1 }
 0xc8c   :  { %1824 = vpow2.f32 %v1084_v54 }
 0xc8f   :  { %v1061_v19 = vpop.xlane.xlu2 %1060 }
 0xc90   :  { %v1073_v20 = vsub.f32 %v1041_v34, %v1061_v19 }
 0xc92   :  { %v2609_v53 = vpop.eup %1824  ;;  %v1086_v21 = vmul.f32 1.442695, %v1073_v20 }
 0xc93   :  { %v1104_v23 = vsel %vm2832_vm5, %v2609_v53, 0.0  ;;  %vm2847_vm5 = vcmask 261120  }
 0xc94   :  { %1826 = vpow2.f32 %v1086_v21  ;;  %1105 = vadd.xlane.f32.xlu1 %v1104_v23 }
 0xc97   :  { %v1720_v50 = vpop.permute.xlu2 %1719  ;;  %v1064_v24 = vpop.xlane.xlu1 %1063 }
 0xc98   :  { %v1721_v25 = vunpack.i.l.bf16 %v1720_v50  ;;  %v1074_v39 = vsub.f32 %v1042_v51, %v1064_v24  ;;  %v1722_v26 = vunpack.i.h.bf16 %v1720_v50 }
 0xc9a   :  { %v2613_v28 = vpop.eup %1826  ;;  %v1088_v33 = vmul.f32 1.442695, %v1074_v39  ;;  %1190 = vmatpush.msra.mxu0 %v1721_v25 }
 0xc9b   :  { %v1107_v37 = vsel %vm2833_vm13, %v2613_v28, 0.0  ;;  %vm2848_vm13 = vmmov %vm2844_vm10 }
 0xc9c   :  { %1828 = vpow2.f32 %v1088_v33  ;;  %1191 = vmatpush.msra.mxu0 %v1722_v26  ;;  %1108 = vadd.xlane.f32.xlu1 %v1107_v37 }
 0xc9f   :  { %v1067_v22 = vpop.xlane.xlu1 %1066 }
 0xca0   :  { %v1075_v38 = vsub.f32 %v2578_v58, %v1067_v22 }
 0xca2   :  { %v1829_v49 = vpop.eup %1828  ;;  %v1090_v48 = vmul.f32 1.442695, %v1075_v38 }
 0xca3   :  { %v1110_v34 = vsel %vm2834_vm15, %v1829_v49, 0.0  ;;  %vm2849_vm15 = vmmov %vm2845_vm12 }
 0xca4   :  { %1830 = vpow2.f32 %v1090_v48  ;;  %1111 = vadd.xlane.f32.xlu1 %v1110_v34 }
 0xca5   :  { %v1055_v17 = vpop.xlane.xlu0 %1054 }
 0xca6   :  { %v1071_v27 = vsub.f32 %v2584_v62, %v1055_v17 }
 0xca8   :  { %v1082_v44 = vmul.f32 1.442695, %v1071_v27 }
 0xcaa   :  { %v1831_v51 = vpop.eup %1830  ;;  %1832 = vpow2.f32 %v1082_v44 }
 0xcab   :  { %v1113_v32 = vsel %vm2835_vm3, %v1831_v51, 0.0  ;;  %vm2850_vm3 = vmmov %vm2846_vm7 }
 0xcac   :  { %1114 = vadd.xlane.f32.xlu1 %v1113_v32 }
 0xcb0   :  { %v1833_v0 = vpop.eup %1832 }
 0xcb1   :  { %v1101_v45 = vsel %vm2836_vm9, %v1833_v0, 0.0  ;;  %vm2851_vm9 = vmmov %vm2847_vm5 }
 0xcb2   :  { %1102 = vadd.xlane.f32.xlu0 %v1101_v45 }
 0xcb8   :  { %v1725_v56 = vpop.permute.xlu0 %1724 }
 0xcb9   :  { %v1726_v58 = vunpack.i.l.bf16 %v1725_v56  ;;  %v1727_v30 = vunpack.i.h.bf16 %v1725_v56 }
 0xcbb   :  { %1192 = vmatpush.msra.mxu0 %v1726_v58 }
 0xcbd   :  { %1193 = vmatpush.msra.mxu0 %v1727_v30 }
 0xcc0   :  { %v1730_v29 = vpop.permute.xlu0 %1729 }
 0xcc1   :  { %v1731_v35 = vunpack.i.l.bf16 %v1730_v29  ;;  %v1732_v61 = vunpack.i.h.bf16 %v1730_v29 }
 0xcc3   :  { %1194 = vmatpush.msra.mxu0 %v1731_v35 }
 0xcc5   :  { %1195 = vmatpush.msra.mxu0 %v1732_v61  ;;  %1734 = vrot.lane.b32.xlu1 %v1733_v15, %s1896_s25  ;;  %v1647_v61 = vld [vmem:[%s2779_s2 + $0x78] sm:$0xff] }
 0xcc6   :  { %1739 = vrot.lane.b32.xlu0 %v1738_v16, %s1896_s25  ;;  %1378 = vmatpush.msra.mxu3 %v1647_v61 }
 0xce7   :  { %v1094_v62 = vpop.xlane.xlu1 %1093 }
 0xce8   :  { %1834 = vrcp.f32 %v1094_v62  ;;  %v1645_v62 = vld [vmem:[%s2779_s2 + $0x58] sm:$0xff] }
 0xcee   :  { %v1835_v5 = vpop.eup %1834 }
 0xcef   :  { %v1124_v47 = vmul.f32 %v1835_v5, %v2597_v3  ;;  %v1097_v42 = vpop.xlane.xlu1 %1096 }
 0xcf0   :  { %1836 = vrcp.f32 %v1097_v42 }
 0xcf1   :  { %1631 = vmatmul.msk.f32.vlgmr.msra.gmra.mxu0 %vm2837_vm11, %v1124_v47  ;;  %vm2852_vm11 = vmmov %vm2847_vm5 }
 0xcf6   :  { %v1837_v57 = vpop.eup %1836 }
 0xcf7   :  { %v1100_v4 = vpop.xlane.xlu2 %1099  ;;  %v1125_v6 = vmul.f32 %v1837_v57, %v2601_v8 }
 0xcf8   :  { %1838 = vrcp.f32 %v1100_v4 }
 0xcf9   :  { %1632 = vmatmul.msk.f32.gmra.mxu0 %vm2838_vm14, %v1125_v6  ;;  %vm2853_vm14 = vmmov %vm2847_vm5 }
 0xcfe   :  { %v1839_v12 = vpop.eup %1838 }
 0xcff   :  { %v1126_v14 = vmul.f32 %v1839_v12, %v2605_v11 }
 0xd01   :  { %1633 = vmatmul.msk.f32.gmra.mxu0 %vm2823_vm0, %v1126_v14  ;;  %vm2854_vm0 = vmmov %vm2847_vm5 }
 0xd07   :  { %v1106_v52 = vpop.xlane.xlu1 %1105 }
 0xd0f   :  { %v1109_v16 = vpop.xlane.xlu1 %1108 }
 0xd17   :  { %v1112_v43 = vpop.xlane.xlu1 %1111 }
 0xd1f   :  { %v1115_v63 = vpop.xlane.xlu1 %1114 }
 0xd25   :  { %v1103_v55 = vpop.xlane.xlu0 %1102 }
 0xd26   :  { %1840 = vrcp.f32 %v1103_v55  ;;  %v1644_v55 = vld [vmem:[%s2779_s2 + $0x48] sm:$0xff] }
 0xd27   :  { %1842 = vrcp.f32 %v1106_v52 }
 0xd28   :  { %1844 = vrcp.f32 %v1109_v16 }
 0xd29   :  { %1846 = vrcp.f32 %v1112_v43 }
 0xd2a   :  { %1848 = vrcp.f32 %v1115_v63 }
 0xd2c   :  { %v1841_v15 = vpop.eup %1840 }
 0xd2d   :  { %v1127_v3 = vmul.f32 %v1841_v15, %v1833_v0  ;;  %v1843_v13 = vpop.eup %1842 }
 0xd2e   :  { %v1128_v7 = vmul.f32 %v1843_v13, %v2609_v53  ;;  %v1845_v46 = vpop.eup %1844 }
 0xd2f   :  { %1634 = vmatmul.msk.f32.gmra.mxu0 %vm2839_vm1, %v1127_v3  ;;  %v1129_v8 = vmul.f32 %v1845_v46, %v2613_v28  ;;  %v1847_v40 = vpop.eup %1846  ;;  %vm2855_vm1 = vmmov %vm2854_vm0 }
 0xd30   :  { %v1130_v9 = vmul.f32 %v1847_v40, %v1829_v49  ;;  %v1849_v41 = vpop.eup %1848 }
 0xd31   :  { %v1131_v10 = vmul.f32 %v1849_v41, %v1831_v51  ;;  %v1756_v51 = vld [vmem:[%s2781_s4 + $0xb] ss:$0 sm:$0xff] }
 0xd37   :  { %1635 = vmatmul.msk.f32.gmra.mxu0 %vm2840_vm4, %v1128_v7  ;;  %v1735_v19 = vpop.permute.xlu1 %1734 }
 0xd38   :  { %v1737_v20 = vunpack.i.h.bf16 %v1735_v19  ;;  %v1736_v53 = vunpack.i.l.bf16 %v1735_v19  ;;  %v1740_v23 = vpop.permute.xlu0 %1739  ;;  %v1758_v19 = vld [vmem:[%s2781_s4 + $0xd] ss:$0 sm:$0xff] }
 0xd39   :  { %v1741_v50 = vunpack.i.l.bf16 %v1740_v23  ;;  %v1742_v24 = vunpack.i.h.bf16 %v1740_v23 }
 0xd3a   :  { %1285 = vmatpush.msrb.mxu2 %v1736_v53 }
 0xd3c   :  { %1286 = vmatpush.msrb.mxu2 %v1737_v20 }
 0xd3e   :  { %1287 = vmatpush.msrb.mxu2 %v1741_v50 }
 0xd3f   :  { %1636 = vmatmul.msk.f32.gmra.mxu0 %vm2841_vm8, %v1129_v8 }
 0xd40   :  { %1288 = vmatpush.msrb.mxu2 %v1742_v24 }
 0xd47   :  { %1637 = vmatmul.msk.f32.gmra.mxu0 %vm2842_vm6, %v1130_v9 }
 0xd4f   :  { %1638 = vmatmul.msk.f32.gmra.mxu0 %vm2843_vm2, %v1131_v10 }
 0xd6e   :  { %v1197_v11 = vpop.f32.mrf.mxu0 }
 0xd76   :  { %v1200_v18 = vpop.f32.mrf.mxu0 }
 0xd7e   :  { %v1203_v36 = vpop.f32.mrf.mxu0 }
 0xd7f   :  { %1223 = vrot.lane.b32.xlu2 %v1203_v36, %s1897_s26 }
 0xdac   :  { %v1206_v1 = vpop.f32.mrf.mxu0 }
 0xdad   :  { %1225 = vrot.lane.b32.xlu0 %v1206_v1, %s1897_s26 }
 0xdb4   :  { %v1209_v54 = vpop.f32.mrf.mxu0 }
 0xdb5   :  { %1231 = vrot.lane.b32.xlu1 %v1209_v54, %s1898_s27 }
 0xdbc   :  { %v1212_v21 = vpop.f32.mrf.mxu0 }
 0xdbd   :  { %1233 = vrot.lane.b32.xlu1 %v1212_v21, %s1898_s27 }
 0xdc4   :  { %v1215_v25 = vpop.f32.mrf.mxu0 }
 0xdc5   :  { %1239 = vrot.lane.b32.xlu2 %v1215_v25, %s1899_s0 }
 0xdcc   :  { %v1218_v39 = vpop.f32.mrf.mxu0 }
 0xdcd   :  { %1241 = vrot.lane.b32.xlu2 %v1218_v39, %s1899_s0 }
 0xdd9   :  { %v1224_v28 = vpop.permute.xlu2 %1223 }
 0xdda   :  { %v1245_v33 = vsel %vm2844_vm10, %v1197_v11, %v1224_v28 }
 0xe1f   :  { %v1240_v26 = vpop.permute.xlu2 %1239  ;;  %v1226_v49 = vpop.permute.xlu0 %1225 }
 0xe20   :  { %v1246_v48 = vsel %vm2848_vm13, %v1200_v18, %v1226_v49  ;;  %v1757_v18 = vld [vmem:[%s2781_s4 + $0xc] ss:$0 sm:$0xff]  ;;  %v1658_v49 = vld [vmem:[%s2780_s3 + $0x78] sm:$0xff] }
 0xe21   :  { %1470 = vmatpush.msrb.mxu1 %v1658_v49  ;;  %1663 = vmatpush.msra.mxu2 %v1658_v49 }
 0xe27   :  { %v1232_v37 = vpop.permute.xlu1 %1231  ;;  %v1242_v17 = vpop.permute.xlu2 %1241 }
 0xe28   :  { %v1247_v22 = vsel %vm2845_vm12, %v1245_v33, %v1232_v37 }
 0xe29   :  { %v1249_v38 = vsel %vm2846_vm7, %v1247_v22, %v1240_v26  ;;  %vm2856_vm7 = vmmov %vm2854_vm0  ;;  %v1759_v26 = vld [vmem:[%s2781_s4 + $0xe] ss:$0 sm:$0xff] }
 0xe2a   :  { %1639 = vmatmul.msk.f32.vlgmr.msrb.gmra.mxu2 %vm2847_vm5, %v1249_v38  ;;  %vm2857_vm5 = vmmov %vm2854_vm0 }
 0xe2f   :  { %v1234_v34 = vpop.permute.xlu1 %1233 }
 0xe30   :  { %v1248_v27 = vsel %vm2849_vm15, %v1246_v48, %v1234_v34  ;;  %v1657_v34 = vld [vmem:[%s2780_s3 + $0x70] sm:$0xff] }
 0xe31   :  { %v1250_v44 = vsel %vm2850_vm3, %v1248_v27, %v1242_v17  ;;  %1471 = vmatpush.msrb.mxu1 %v1657_v34  ;;  %1664 = vmatpush.msra.mxu2 %v1657_v34  ;;  %vm2858_vm3 = vcmask 523264  }
 0xe32   :  { %1640 = vmatmul.msk.f32.gmra.mxu2 %vm2851_vm9, %v1250_v44  ;;  %vm2859_vm9 = vmmov %vm2858_vm3 }
 0xead   :  { %v1290_v32 = vpop.f32.mrf.mxu2 }
 0xeae   :  { %v1296_v0 = vadd.f32 %v1290_v32, %v2441_v2  ;;  %v1646_v2 = vld [vmem:[%s2779_s2 + $0x68] sm:$0xff] }
 0xeaf   :  { %1379 = vmatpush.msra.mxu3 %v1646_v2 }
 0xeb0   :  { %v2661_v45 = vadd.f32 %v1756_v51, %v1296_v0  ;;  %v1655_v0 = vld [vmem:[%s2780_s3 + $0x60] sm:$0xff] }
 0xeb1   :  { %1380 = vmatpush.msra.mxu3 %v1645_v62  ;;  %v1652_v62 = vld [vmem:[%s2780_s3 + $0x48] sm:$0xff] }
 0xeb2   :  { %v1304_v56 = vsel %vm2852_vm11, %v2661_v45, 0.0  ;;  %vm1494_vm11 = vcmask 1040384  }
 0xeb3   :  { %1305 = vadd.xlane.f32.xlu0 %v1304_v56  ;;  %1381 = vmatpush.msra.mxu3 %v1644_v55 }
 0xeb5   :  { %v1293_v58 = vpop.f32.mrf.mxu2 }
 0xeb6   :  { %v1297_v30 = vadd.f32 %v1293_v58, %v2446_v60  ;;  %v1654_v58 = vld [vmem:[%s2780_s3 + $0x58] sm:$0xff] }
 0xeb8   :  { %v2666_v29 = vadd.f32 %v1756_v51, %v1297_v30  ;;  %v1656_v51 = vld [vmem:[%s2780_s3 + $0x68] sm:$0xff] }
 0xeb9   :  { %1472 = vmatpush.msrb.mxu1 %v1656_v51  ;;  %1665 = vmatpush.msra.mxu2 %v1656_v51 }
 0xeba   :  { %v1307_v35 = vsel %vm2853_vm14, %v2666_v29, 0.0  ;;  %vm1498_vm14 = vcmask 254976  }
 0xebb   :  { %1308 = vadd.xlane.f32.xlu1 %v1307_v35  ;;  %1473 = vmatpush.msrb.mxu1 %v1655_v0  ;;  %v1653_v35 = vld [vmem:[%s2780_s3 + $0x50] sm:$0xff] }
 0xebc   :  { %1666 = vmatpush.msra.mxu2 %v1655_v0 }
 0xebd   :  { %1474 = vmatpush.msrb.mxu1 %v1654_v58 }
 0xebe   :  { %1667 = vmatpush.msra.mxu2 %v1654_v58 }
 0xebf   :  { %1475 = vmatpush.msrb.mxu1 %v1653_v35 }
 0xec0   :  { %1668 = vmatpush.msra.mxu2 %v1653_v35 }
 0xec1   :  { %1476 = vmatpush.msrb.mxu1 %v1652_v62 }
 0xec2   :  { %1669 = vmatpush.msra.mxu2 %v1652_v62 }
 0xf26   :  { %v1306_v60 = vpop.xlane.xlu0 %1305 }
 0xf27   :  { %v1310_v5 = vmul.f32 %v1306_v60, %v2046_v59 }
 0xf29   :  { %v1312_v47 = vsub.f32 %v2661_v45, %v1310_v5  ;;  %v1651_v5 = vld [vmem:[%s2780_s3 + $0x40] sm:$0xff] }
 0xf2a   :  { %1477 = vmatpush.msrb.mxu1 %v1651_v5  ;;  %1670 = vmatpush.msra.mxu2 %v1651_v5  ;;  %v1528_v5 = vld [vmem:[%s2778_s1 + $0xf0] sm:$0xff] }
 0xf2b   :  { %v1314_v42 = vmul.f32 %v1312_v47, %v1312_v47  ;;  %1546 = vmatpush.msrb.mxu3 %v1528_v5 }
 0xf2d   :  { %v1316_v57 = vsel %vm2854_vm0, %v1314_v42, 0.0 }
 0xf2e   :  { %1317 = vadd.xlane.f32.xlu2 %v1316_v57  ;;  %v1309_v4 = vpop.xlane.xlu1 %1308 }
 0xf2f   :  { %v1311_v6 = vmul.f32 %v1309_v4, %v2046_v59 }
 0xf31   :  { %v1313_v12 = vsub.f32 %v2666_v29, %v1311_v6 }
 0xf33   :  { %v1315_v14 = vmul.f32 %v1313_v12, %v1313_v12 }
 0xf35   :  { %v1319_v52 = vsel %vm2855_vm1, %v1315_v14, 0.0 }
 0xf36   :  { %1320 = vadd.xlane.f32.xlu0 %v1319_v52 }
 0xfa1   :  { %v1318_v15 = vpop.xlane.xlu2 %1317 }
 0xfa2   :  { %v1322_v16 = vmul.f32 %v1318_v15, %v2046_v59 }
 0xfa4   :  { %v1324_v3 = vadd.f32 1e-06, %v1322_v16 }
 0xfa6   :  { %1850 = vrsqrt.f32 %v1324_v3  ;;  %vm1332_vm8 = vweird.f32 %v1324_v3 }
 0xfa9   :  { %v1321_v13 = vpop.xlane.xlu0 %1320 }
 0xfaa   :  { %v1323_v7 = vmul.f32 %v1321_v13, %v2046_v59 }
 0xfac   :  { %v1851_v43 = vpop.eup %1850  ;;  %v1325_v46 = vadd.f32 1e-06, %v1323_v7 }
 0xfad   :  { %v1327_v8 = vmul.f32 %v1851_v43, %v1324_v3  ;;  %vm1333_vm4 = vweird.f32 %v1851_v43 }
 0xfae   :  { %1852 = vrsqrt.f32 %v1325_v46  ;;  %vm1334_vm6 = vmor %vm1332_vm8, %vm1333_vm4  ;;  %vm1342_vm10 = vweird.f32 %v1325_v46 }
 0xfaf   :  { %v1328_v63 = vmul.f32 %v1851_v43, %v1327_v8  ;;  %vm2860_vm8 = vmmov %vm2857_vm5 }
 0xfb1   :  { %v1329_v40 = vmul.f32 0.5, %v1328_v63 }
 0xfb3   :  { %v1330_v9 = vsub.f32 1.5, %v1329_v40 }
 0xfb4   :  { %v1853_v41 = vpop.eup %1852 }
 0xfb5   :  { %v1331_v10 = vmul.f32 %v1851_v43, %v1330_v9  ;;  %v1337_v11 = vmul.f32 %v1853_v41, %v1325_v46  ;;  %vm1343_vm2 = vweird.f32 %v1853_v41 }
 0xfb6   :  { %vm1344_vm12 = vmor %vm1342_vm10, %vm1343_vm2 }
 0xfb7   :  { %v1335_v36 = vsel %vm1334_vm6, %v1851_v43, %v1331_v10  ;;  %v1338_v1 = vmul.f32 %v1853_v41, %v1337_v11  ;;  %vm1554_vm6 = vcmask 74752  }
 0xfb8   :  { %v1346_v54 = vmul.f32 %v1335_v36, %v1312_v47 }
 0xfb9   :  { %v1339_v20 = vmul.f32 0.5, %v1338_v1 }
 0xfba   :  { %v1349_v53 = vmul.f32 %v1757_v18, %v1346_v54 }
 0xfbb   :  { %v1340_v21 = vsub.f32 1.5, %v1339_v20 }
 0xfbc   :  { %v1352_v23 = vadd.f32 %v1758_v19, %v1349_v53 }
 0xfbd   :  { %v1341_v50 = vmul.f32 %v1853_v41, %v1340_v21 }
 0xfbe   :  { %1649 = vmatmul.msk.f32.vlgmr.msra.gmra.mxu3 %vm2856_vm7, %v1352_v23 }
 0xfbf   :  { %v1345_v24 = vsel %vm1344_vm12, %v1853_v41, %v1341_v50 }
 0xfc0   :  { %v1347_v25 = vmul.f32 %v1345_v24, %v1313_v12 }
 0xfc2   :  { %v1350_v39 = vmul.f32 %v1757_v18, %v1347_v25 }
 0xfc4   :  { %v1353_v28 = vadd.f32 %v1758_v19, %v1350_v39 }
 0xfc6   :  { %1650 = vmatmul.msk.f32.gmra.mxu3 %vm2857_vm5, %v1353_v28 }
0x1041   :  { %v1383_v33 = vpop.f32.mrf.mxu3 }
0x1042   :  { %v2701_v37 = vadd.f32 %v1759_v26, %v1383_v33 }
0x1044   :  { %v2704_v22 = vmul.f32 0.70710677, %v2701_v37  ;;  %v1389_v25 = vmul.f32 0.5, %v2701_v37 }
0x1046   :  { %v1397_v38 = vand.u32 2147483647, %v2704_v22  ;;  %vm1393_vm13 = vcmp.ge.f32.partialorder %v2704_v22, 0.0 }
0x1047   :  { %v1395_v23 = vsel %vm1393_vm13, 1.0, %v1900_v31 }
0x1048   :  { %v1399_v48 = vmul.f32 0.3275911, %v1397_v38  ;;  %v1429_v57 = vsub.f32 0.0, %v1397_v38 }
0x1049   :  { %v1386_v17 = vpop.f32.mrf.mxu3 }
0x104a   :  { %v1401_v27 = vadd.f32 1.0, %v1399_v48  ;;  %v2713_v44 = vadd.f32 %v1759_v26, %v1386_v17  ;;  %v1431_v52 = vmul.f32 %v1429_v57, %v1397_v38 }
0x104c   :  { %1854 = vrcp.f32 %v1401_v27  ;;  %v2719_v32 = vmul.f32 0.70710677, %v2713_v44  ;;  %v1433_v13 = vmul.f32 1.442695, %v1431_v52  ;;  %v1390_v34 = vmul.f32 0.5, %v2713_v44 }
0x104e   :  { %v1398_v56 = vand.u32 2147483647, %v2719_v32  ;;  %vm1394_vm15 = vcmp.ge.f32.partialorder %v2719_v32, 0.0  ;;  %v1760_v32 = vld [vmem:[%s2781_s4 + $0xf] ss:$0 sm:$0xff] }
0x104f   :  { %v1396_v22 = vsel %vm1394_vm15, 1.0, %v1900_v31 }
0x1050   :  { %v1400_v30 = vmul.f32 0.3275911, %v1398_v56  ;;  %v1430_v7 = vsub.f32 0.0, %v1398_v56 }
0x1052   :  { %v1855_v61 = vpop.eup %1854  ;;  %v1402_v2 = vadd.f32 1.0, %v1400_v30  ;;  %v1432_v40 = vmul.f32 %v1430_v7, %v1398_v56 }
0x1053   :  { %v1405_v60 = vmul.f32 %v1855_v61, %v1401_v27 }
0x1054   :  { %1856 = vrcp.f32 %v1402_v2  ;;  %v1435_v18 = vmul.f32 1.442695, %v1432_v40 }
0x1055   :  { %v1407_v47 = vsub.f32 2.0, %v1405_v60  ;;  %1858 = vpow2.f32 %v1433_v13 }
0x1056   :  { %1860 = vpow2.f32 %v1435_v18 }
0x1057   :  { %v1409_v42 = vmul.f32 %v1855_v61, %v1407_v47  ;;  %v1526_v47 = vld [vmem:[%s2778_s1 + $0xe0] sm:$0xff] }
0x1059   :  { %v1411_v4 = vmul.f32 1.0614054, %v1409_v42 }
0x105a   :  { %v1857_v6 = vpop.eup %1856 }
0x105b   :  { %v1413_v12 = vadd.f32 -1.4531521, %v1411_v4  ;;  %v1406_v14 = vmul.f32 %v1857_v6, %v1402_v2  ;;  %v1859_v54 = vpop.eup %1858 }
0x105c   :  { %v1861_v26 = vpop.eup %1860 }
0x105d   :  { %v1415_v55 = vmul.f32 %v1413_v12, %v1409_v42  ;;  %v1408_v15 = vsub.f32 2.0, %v1406_v14 }
0x105f   :  { %v1417_v16 = vadd.f32 1.4214138, %v1415_v55  ;;  %v1410_v3 = vmul.f32 %v1857_v6, %v1408_v15 }
0x1061   :  { %v1419_v43 = vmul.f32 %v1417_v16, %v1409_v42  ;;  %v1412_v46 = vmul.f32 1.0614054, %v1410_v3 }
0x1063   :  { %v1421_v8 = vadd.f32 -0.28449672, %v1419_v43  ;;  %v1414_v63 = vadd.f32 -1.4531521, %v1412_v46 }
0x1065   :  { %v1423_v9 = vmul.f32 %v1421_v8, %v1409_v42  ;;  %v1416_v41 = vmul.f32 %v1414_v63, %v1410_v3  ;;  %v1763_v8 = vld [vmem:[%s2778_s1 + $0xc4] ss:$0 sm:$0xff] }
0x1067   :  { %v1425_v10 = vadd.f32 0.2548296, %v1423_v9  ;;  %v1418_v11 = vadd.f32 1.4214138, %v1416_v41 }
0x1069   :  { %v1427_v36 = vmul.f32 %v1425_v10, %v1409_v42  ;;  %v1420_v1 = vmul.f32 %v1418_v11, %v1410_v3  ;;  %v1525_v42 = vld [vmem:[%s2778_s1 + $0xd8] sm:$0xff] }
0x106b   :  { %v1437_v19 = vmul.f32 %v1859_v54, %v1427_v36  ;;  %v1422_v20 = vadd.f32 -0.28449672, %v1420_v1 }
0x106d   :  { %v1439_v53 = vsub.f32 1.0, %v1437_v19  ;;  %v1424_v21 = vmul.f32 %v1422_v20, %v1410_v3 }
0x106f   :  { %v1441_v50 = vmul.f32 %v1439_v53, %v1395_v23  ;;  %v1426_v24 = vadd.f32 0.2548296, %v1424_v21 }
0x1071   :  { %v1443_v39 = vadd.f32 1.0, %v1441_v50  ;;  %v1428_v28 = vmul.f32 %v1426_v24, %v1410_v3  ;;  %v1761_v3 = vld [vmem:[%s2778_s1 + $0xc2] ss:$0 sm:$0xff] }
0x1073   :  { %v1445_v33 = vmul.f32 %v1443_v39, %v1389_v25  ;;  %v1438_v38 = vmul.f32 %v1861_v26, %v1428_v28 }
0x1075   :  { %v1440_v49 = vsub.f32 1.0, %v1438_v38  ;;  %1659 = vmatmul.msk.f32.vlgmr.msrb.gmra.mxu1 %vm2858_vm3, %v1445_v33 }
0x1077   :  { %v1442_v48 = vmul.f32 %v1440_v49, %v1396_v22 }
0x1079   :  { %v1444_v17 = vadd.f32 1.0, %v1442_v48 }
0x107b   :  { %v1446_v27 = vmul.f32 %v1444_v17, %v1390_v34 }
0x107d   :  { %1660 = vmatmul.msk.f32.vlgmr.msra.gmra.mxu2 %vm2859_vm9, %v1446_v27 }
0x10f2   :  { %v1479_v37 = vpop.f32.mrf.mxu1 }
0x10f3   :  { %v1485_v0 = vadd.f32 %v1479_v37, %v2661_v45 }
0x10f5   :  { %v1489_v31 = vadd.f32 %v1760_v32, %v1485_v0 }
0x1100   :  { %v1482_v51 = vpop.f32.mrf.mxu2 }
0x1101   :  { %v1486_v56 = vadd.f32 %v1482_v51, %v2666_v29  ;;  %v1527_v29 = vld [vmem:[%s2778_s1 + $0xe8] sm:$0xff] }
0x1102   :  { %1547 = vmatpush.msrb.mxu3 %v1527_v29 }
0x1103   :  { %v1490_v58 = vadd.f32 %v1760_v32, %v1486_v56 }
0x1104   :  { %1548 = vmatpush.msrb.mxu3 %v1526_v47 }
0x1105   :  { %v1492_v30 = vrot.slane %v1490_v58, 7 }
0x1106   :  { %1549 = vmatpush.msrb.mxu3 %v1525_v42 }
0x1107   :  { %v1495_v44 = vsel %vm1494_vm11, %v1489_v31, %v1492_v30 }
0x1108   :  { %v1499_v35 = vsel %vm1498_vm14, %v1495_v44, 0.0 }
0x1109   :  { %1500 = vadd.xlane.f32.xlu2 %v1499_v35 }
0x117c   :  { %v1501_v61 = vpop.xlane.xlu2 %1500 }
0x117d   :  { %v1502_v2 = vmul.f32 %v1501_v61, %v2046_v59 }
0x117f   :  { %v1503_v62 = vsub.f32 %v1495_v44, %v1502_v2 }
0x1181   :  { %v1504_v60 = vmul.f32 %v1503_v62, %v1503_v62 }
0x1183   :  { %v1505_v45 = vsel %vm1498_vm14, %v1504_v60, 0.0 }
0x1184   :  { %1506 = vadd.xlane.f32.xlu1 %v1505_v45 }
0x11f7   :  { %v1507_v57 = vpop.xlane.xlu1 %1506 }
0x11f8   :  { %v1508_v4 = vmul.f32 %v1507_v57, %v2046_v59  ;;  %v1762_v59 = vld [vmem:[%s2778_s1 + $0xc3] ss:$0 sm:$0xff] }
0x11fa   :  { %v1509_v6 = vadd.f32 1e-06, %v1508_v4 }
0x11fc   :  { %1862 = vrsqrt.f32 %v1509_v6  ;;  %vm1516_vm1 = vweird.f32 %v1509_v6 }
0x1202   :  { %v1863_v12 = vpop.eup %1862 }
0x1203   :  { %v1511_v14 = vmul.f32 %v1863_v12, %v1509_v6  ;;  %vm1517_vm0 = vweird.f32 %v1863_v12 }
0x1204   :  { %vm1518_vm4 = vmor %vm1516_vm1, %vm1517_vm0 }
0x1205   :  { %v1512_v52 = vmul.f32 %v1863_v12, %v1511_v14 }
0x1207   :  { %v1513_v55 = vmul.f32 0.5, %v1512_v52 }
0x1209   :  { %v1514_v15 = vsub.f32 1.5, %v1513_v55 }
0x120b   :  { %v1515_v16 = vmul.f32 %v1863_v12, %v1514_v15 }
0x120d   :  { %v1519_v13 = vsel %vm1518_vm4, %v1863_v12, %v1515_v16 }
0x120e   :  { %v1520_v7 = vmul.f32 %v1519_v13, %v1503_v62 }
0x1210   :  { %v1522_v43 = vmul.f32 %v1761_v3, %v1520_v7 }
0x1212   :  { %v1524_v46 = vadd.f32 %v1762_v59, %v1522_v43 }
0x1214   :  { %1662 = vmatmul.msk.f32.vlgmr.msrb.gmra.mxu3 %vm2860_vm8, %v1524_v46 }
0x1297   :  { %v1551_v63 = vpop.f32.mrf.mxu3 }
0x1298   :  { %v1552_v40 = vadd.f32 %v1763_v8, %v1551_v63 }
0x129a   :  { %1555 = vst.msk [vmem:[#allocation2] sm:$0x3] %vm1554_vm6, %v1552_v40 }
0x129b   :  { %1566 = dma.vmem_to_hbm [thread:$0]  %s1562_s10, 32, %s1564_s13, [#allocation3]  }
0x129c   :  { %1888 = dma.done.wait [#allocation3], 32  }
0x129d   :  { %1889 = vsyncadd [#allocation3], 4294967264 }
0x129e   :  { %1571 = vsyncpa [#allocation3], 1 }

</bundles_post_ra>
